<compile_context>
chip_gen: v5e
topology: v5e:2x2
jax: 0.10.0
libtpu: 0.0.40
codegen_flags: <defaults>
</compile_context>

<pallas_src>
import jax
import jax.numpy as jnp
from jax.experimental import pallas as pl
from jax.experimental.pallas import tpu as pltpu

B, C, H, W = 2, 2048, 7, 7          # ResNet50 backbone output for a 224x224 image
S = H * W                           # 49
NUM_CLASSES = 8
MAX_BATCH_BLOCK = 8                 # examples processed per grid step (VMEM-safe on v7x)


def vea_head_kernel(x_ref, w_ref, b_ref, out_ref):
    # x_ref:   [bb, C, S]  batch block of backbone feature maps
    # w_ref:   [8, C]      classifier8 weight, PyTorch layout
    # b_ref:   [1, 8]      classifier8 bias
    # out_ref: [bb, 8]     softmax probabilities
    bb = x_ref.shape[0]
    s = x_ref.shape[2]
    w = w_ref[...]                                               # [8, C]
    bias = b_ref[...]                                            # [1, 8]
    ones_row = jnp.ones((1, s), dtype=jnp.float32)               # hoisted out of the loop
    inv_s = 1.0 / s

    rows = []
    for i in range(bb):                                          # static unroll over block
        x = x_ref[i]                                             # [C, S]
        # classifier-first on the MXU: K = C = 2048 contraction, N = S = 49 lanes.
        t = jnp.dot(w, x, preferred_element_type=jnp.float32)    # [8, S]
        # pool-after: sum over the S spatial positions as a tiny A @ B^T matmul, which also
        # lands the 8 per-class sums directly on the lane axis (no separate relayout).
        sums = jnp.einsum('os,ks->ok', ones_row, t,
                          preferred_element_type=jnp.float32)    # [1, 8]
        rows.append(sums * inv_s + bias)                         # [1, 8] logits

    logits = jnp.concatenate(rows, axis=0)                       # [bb, 8]

    # softmax over dim=1 (numerically stable), vectorised over the batch block
    m = jnp.max(logits, axis=1, keepdims=True)
    e = jnp.exp(logits - m)
    out_ref[...] = e / jnp.sum(e, axis=1, keepdims=True)


def stimuli_aware_vea_head(feat_nchw, w8, b8, *, batch_block=MAX_BATCH_BLOCK):
    """feat_nchw: [B, 2048, 7, 7] float32 (ResNet50 backbone output).
       w8: [8, 2048] classifier8 weight (PyTorch layout). b8: [8] bias.
       Returns emotion probabilities [B, 8]."""
    Bn, Cn, Hn, Wn = feat_nchw.shape
    Sn = Hn * Wn
    bb = min(Bn, batch_block)

    # Free, contiguous reshape (no relayout / no extra XLA transpose op).
    x = feat_nchw.reshape(Bn, Cn, Sn)                            # [B, C, S]
    b2 = b8.reshape(1, NUM_CLASSES)

    cost = pl.CostEstimate(
        flops=Bn * (2 * NUM_CLASSES * Cn * Sn + 2 * NUM_CLASSES * Sn + 5 * NUM_CLASSES),
        transcendentals=Bn * NUM_CLASSES,
        bytes_accessed=4 * (Bn * Cn * Sn + NUM_CLASSES * Cn
                            + NUM_CLASSES + Bn * NUM_CLASSES),
    )

    return pl.pallas_call(
        vea_head_kernel,
        out_shape=jax.ShapeDtypeStruct((Bn, NUM_CLASSES), jnp.float32),
        grid=(pl.cdiv(Bn, bb),),                                 # batch-blocked grid
        in_specs=[
            pl.BlockSpec((bb, Cn, Sn), lambda b: (b, 0, 0)),     # <= ~3.2 MiB block
            pl.BlockSpec((NUM_CLASSES, Cn), lambda b: (0, 0)),   # weight resident across steps
            pl.BlockSpec((1, NUM_CLASSES), lambda b: (0, 0)),    # bias resident across steps
        ],
        out_specs=pl.BlockSpec((bb, NUM_CLASSES), lambda b: (b, 0)),
        compiler_params=pltpu.CompilerParams(
            dimension_semantics=("parallel",)),                  # lets v7x use both TensorCores
        cost_estimate=cost,
    )(x, w8, b2)


if __name__ == "__main__":
    key = jax.random.PRNGKey(0)
    k_feat, k_w, k_b = jax.random.split(key, 3)

    # Deterministic synthetic backbone output and classifier8 params
    # (PyTorch Linear default init: U(-1/sqrt(fan_in), 1/sqrt(fan_in))).
    feat = jax.random.normal(k_feat, (B, C, H, W), dtype=jnp.float32)
    bound = 1.0 / jnp.sqrt(jnp.float32(C))
    w8 = jax.random.uniform(k_w, (NUM_CLASSES, C), dtype=jnp.float32,
                            minval=-bound, maxval=bound)         # PyTorch layout [8, 2048]
    b8 = jax.random.uniform(k_b, (NUM_CLASSES,), dtype=jnp.float32,
                            minval=-bound, maxval=bound)

    emotion = stimuli_aware_vea_head(feat, w8, b8)
    emotion = jax.block_until_ready(emotion)

    # Pure-JAX reference for correctness check (high-precision matmul).
    pooled_ref = jnp.mean(feat.reshape(B, C, S), axis=2)         # [B, 2048]
    logits_ref = jnp.einsum('bc,kc->bk', pooled_ref, w8,
                            precision=jax.lax.Precision.HIGHEST) + b8
    emotion_ref = jax.nn.softmax(logits_ref, axis=1)

    assert emotion.shape == (B, NUM_CLASSES)
    assert jnp.allclose(emotion, emotion_ref, atol=5e-5, rtol=1e-4)
    assert jnp.allclose(jnp.sum(emotion, axis=1), 1.0, atol=1e-5)

    print("KERNEL_OK")
</pallas_src>

<mosaic_0001>
module attributes {stable_mosaic.version = 11 : i64} {
  func.func @vea_head_kernel(%arg0: i32, %arg1: memref<2x2048x49xf32, #tpu.memory_space<vmem>>, %arg2: memref<8x2048xf32, #tpu.memory_space<vmem>>, %arg3: memref<1x8xf32, #tpu.memory_space<vmem>>, %arg4: memref<2x8xf32, #tpu.memory_space<vmem>>) attributes {dimension_semantics = [#tpu.dimension_semantics<parallel>], iteration_bounds = array<i64: 1>, scalar_prefetch = 0 : i64, scratch_operands = 0 : i64, tpu.core_type = #tpu.core_type<tc>, window_params = [{transform_indices = @transform_0, window_bounds = array<i64: 2, 2048, 49>}, {pipeline_mode = #tpu.pipeline_mode<synchronous>, transform_indices = @transform_1, window_bounds = array<i64: 8, 2048>}, {pipeline_mode = #tpu.pipeline_mode<synchronous>, transform_indices = @transform_2, window_bounds = array<i64: 1, 8>}, {transform_indices = @transform_3, window_bounds = array<i64: 2, 8>}]} {
    %c0 = arith.constant 0 : index
    %c0_0 = arith.constant 0 : index
    %0 = vector.load %arg2[%c0, %c0_0] : memref<8x2048xf32, #tpu.memory_space<vmem>>, vector<8x2048xf32>
    %c0_1 = arith.constant 0 : index
    %c0_2 = arith.constant 0 : index
    %1 = vector.load %arg3[%c0_1, %c0_2] : memref<1x8xf32, #tpu.memory_space<vmem>>, vector<1x8xf32>
    %cst = arith.constant 1.000000e+00 : f32
    %2 = vector.broadcast %cst : f32 to vector<1x49xf32>
    %c0_3 = arith.constant 0 : index
    %c0_4 = arith.constant 0 : index
    %c0_5 = arith.constant 0 : index
    %3 = vector.load %arg1[%c0_3, %c0_4, %c0_5] : memref<2x2048x49xf32, #tpu.memory_space<vmem>>, vector<1x2048x49xf32>
    %4 = vector.shape_cast %3 : vector<1x2048x49xf32> to vector<2048x49xf32>
    %cst_6 = arith.constant dense<0.000000e+00> : vector<8x49xf32>
    %5 = tpu.matmul %0, %4, %cst_6 {dimension_numbers = #tpu.dot_dimension_numbers<[1], [0], [0], [1], [0, 0, 1, 1], [], []>} : vector<8x2048xf32>, vector<2048x49xf32>, vector<8x49xf32> -> vector<8x49xf32>
    "tpu.trace_start"() <{level = 10 : i32, message = "os,ks->ok"}> : () -> ()
    %cst_7 = arith.constant dense<0.000000e+00> : vector<1x8xf32>
    %6 = tpu.matmul %2, %5, %cst_7 {dimension_numbers = #tpu.dot_dimension_numbers<[1], [1], [0], [0], [0, 0, 1, 0], [], []>} : vector<1x49xf32>, vector<8x49xf32>, vector<1x8xf32> -> vector<1x8xf32>
    "tpu.trace_stop"() : () -> ()
    %cst_8 = arith.constant 0.0204081628 : f32
    %7 = vector.broadcast %cst_8 : f32 to vector<1x8xf32>
    %8 = arith.mulf %6, %7 : vector<1x8xf32>
    %9 = arith.addf %8, %1 : vector<1x8xf32>
    %c1 = arith.constant 1 : index
    %c0_9 = arith.constant 0 : index
    %c0_10 = arith.constant 0 : index
    %10 = vector.load %arg1[%c1, %c0_9, %c0_10] : memref<2x2048x49xf32, #tpu.memory_space<vmem>>, vector<1x2048x49xf32>
    %11 = vector.shape_cast %10 : vector<1x2048x49xf32> to vector<2048x49xf32>
    %cst_11 = arith.constant dense<0.000000e+00> : vector<8x49xf32>
    %12 = tpu.matmul %0, %11, %cst_11 {dimension_numbers = #tpu.dot_dimension_numbers<[1], [0], [0], [1], [0, 0, 1, 1], [], []>} : vector<8x2048xf32>, vector<2048x49xf32>, vector<8x49xf32> -> vector<8x49xf32>
    "tpu.trace_start"() <{level = 10 : i32, message = "os,ks->ok"}> : () -> ()
    %cst_12 = arith.constant dense<0.000000e+00> : vector<1x8xf32>
    %13 = tpu.matmul %2, %12, %cst_12 {dimension_numbers = #tpu.dot_dimension_numbers<[1], [1], [0], [0], [0, 0, 1, 0], [], []>} : vector<1x49xf32>, vector<8x49xf32>, vector<1x8xf32> -> vector<1x8xf32>
    "tpu.trace_stop"() : () -> ()
    %cst_13 = arith.constant 0.0204081628 : f32
    %14 = vector.broadcast %cst_13 : f32 to vector<1x8xf32>
    %15 = arith.mulf %13, %14 : vector<1x8xf32>
    %16 = arith.addf %15, %1 : vector<1x8xf32>
    %17 = tpu.concatenate %9, %16 in 0 : vector<1x8xf32>, vector<1x8xf32> -> vector<2x8xf32>
    %cst_14 = arith.constant dense<0xFF800000> : vector<2xf32>
    %18 = vector.multi_reduction <maximumf>, %17, %cst_14 [1] : vector<2x8xf32> to vector<2xf32>
    %19 = vector.shape_cast %18 : vector<2xf32> to vector<2x1xf32>
    %20 = vector.broadcast %19 : vector<2x1xf32> to vector<2x8xf32>
    %21 = arith.subf %17, %20 : vector<2x8xf32>
    %22 = math.exp %21 : vector<2x8xf32>
    %cst_15 = arith.constant dense<0.000000e+00> : vector<2xf32>
    %23 = vector.multi_reduction <add>, %22, %cst_15 [1] : vector<2x8xf32> to vector<2xf32>
    %24 = vector.shape_cast %23 : vector<2xf32> to vector<2x1xf32>
    %25 = vector.broadcast %24 : vector<2x1xf32> to vector<2x8xf32>
    %26 = arith.divf %22, %25 : vector<2x8xf32>
    %c0_16 = arith.constant 0 : index
    %c0_17 = arith.constant 0 : index
    %27 = vector.load %arg4[%c0_16, %c0_17] : memref<2x8xf32, #tpu.memory_space<vmem>>, vector<2x8xf32>
    tpu.vector_store %arg4[%c0_16, %c0_17], %26 {strides = array<i32>} : memref<2x8xf32, #tpu.memory_space<vmem>>, vector<2x8xf32>,
    return
  }
  func.func @transform_0(%arg0: i32) -> (i32, i32, i32) {
    %c0_i32 = arith.constant 0 : i32
    %c0_i32_0 = arith.constant 0 : i32
    %c0_i32_1 = arith.constant 0 : i32
    return %arg0, %c0_i32, %c0_i32_0 : i32, i32, i32
  }
  func.func @transform_1(%arg0: i32) -> (i32, i32) {
    %c0_i32 = arith.constant 0 : i32
    %c0_i32_0 = arith.constant 0 : i32
    %c0_i32_1 = arith.constant 0 : i32
    return %c0_i32, %c0_i32_0 : i32, i32
  }
  func.func @transform_2(%arg0: i32) -> (i32, i32) {
    %c0_i32 = arith.constant 0 : i32
    %c0_i32_0 = arith.constant 0 : i32
    %c0_i32_1 = arith.constant 0 : i32
    return %c0_i32, %c0_i32_0 : i32, i32
  }
  func.func @transform_3(%arg0: i32) -> (i32, i32) {
    %c0_i32 = arith.constant 0 : i32
    %c0_i32_0 = arith.constant 0 : i32
    return %arg0, %c0_i32 : i32, i32
  }
}

</mosaic_0001>

<bundles_post_ra>
// kernel: tpu_custom_call.1
= control target key start
LH: loop header
LB: loop body
LE: loop exit
PB: predicated region body
PF: predicated region fallthrough
CT: control target
= control target key end

     0   :  { %s3263_s0 = inlined_call_operand.vmem [shape: f32[2,2048,49], index: 0, kind: input, shape index: {}]   ;;  %s3264_s1 = inlined_call_operand.vmem [shape: f32[8,2048], index: 1, kind: input, shape index: {}]   ;;  %s3265_s2 = inlined_call_operand.vmem [shape: f32[1,8], index: 2, kind: input, shape index: {}]   ;;  %s3266_s3 = inlined_call_operand.hbm [shape: f32[2,8], index: 3, kind: output, shape index: {}]  }
   0x1   :  { %v47_v0 = vld [vmem:[%s3263_s0 + $0x78] sm:$0xff]  ;;  %v46_v2 = vld [vmem:[%s3263_s0 + $0x70] sm:$0xff]  ;;  %v45_v6 = vld [vmem:[%s3263_s0 + $0x68] sm:$0xff] }
   0x2   :  { %v79_v1 = vld [vmem:[%s3263_s0 + $0x178] sm:$0xff]  ;;  %288 = vmatpush.msra.mxu0 %v47_v0  ;;  %v78_v4 = vld [vmem:[%s3263_s0 + $0x170] sm:$0xff]  ;;  %v77_v8 = vld [vmem:[%s3263_s0 + $0x168] sm:$0xff] }
   0x3   :  { %328 = vmatpush.msra.mxu2 %v79_v1  ;;  %v63_v3 = vld [vmem:[%s3263_s0 + $0xf8] sm:$0xff]  ;;  %v62_v7 = vld [vmem:[%s3263_s0 + $0xf0] sm:$0xff]  ;;  %v61_v10 = vld [vmem:[%s3263_s0 + $0xe8] sm:$0xff] }
   0x4   :  { %v95_v5 = vld [vmem:[%s3263_s0 + $0x1f8] sm:$0xff]  ;;  %308 = vmatpush.msra.mxu1 %v63_v3  ;;  %289 = vmatpush.msra.mxu0 %v46_v2  ;;  %v94_v9 = vld [vmem:[%s3263_s0 + $0x1f0] sm:$0xff]  ;;  %v44_v11 = vld [vmem:[%s3263_s0 + $0x60] sm:$0xff] }
   0x5   :  { %348 = vmatpush.msra.mxu3 %v95_v5  ;;  %329 = vmatpush.msra.mxu2 %v78_v4  ;;  %v76_v12 = vld [vmem:[%s3263_s0 + $0x160] sm:$0xff]  ;;  %v93_v13 = vld [vmem:[%s3263_s0 + $0x1e8] sm:$0xff]  ;;  %v43_v16 = vld [vmem:[%s3263_s0 + $0x58] sm:$0xff] }
   0x6   :  { %309 = vmatpush.msra.mxu1 %v62_v7  ;;  %290 = vmatpush.msra.mxu0 %v45_v6  ;;  %v60_v14 = vld [vmem:[%s3263_s0 + $0xe0] sm:$0xff]  ;;  %v75_v17 = vld [vmem:[%s3263_s0 + $0x158] sm:$0xff]  ;;  %v42_v20 = vld [vmem:[%s3263_s0 + $0x50] sm:$0xff] }
   0x7   :  { %349 = vmatpush.msra.mxu3 %v94_v9  ;;  %330 = vmatpush.msra.mxu2 %v77_v8  ;;  %v92_v15 = vld [vmem:[%s3263_s0 + $0x1e0] sm:$0xff]  ;;  %v59_v18 = vld [vmem:[%s3263_s0 + $0xd8] sm:$0xff]  ;;  %v74_v21 = vld [vmem:[%s3263_s0 + $0x150] sm:$0xff] }
   0x8   :  { %310 = vmatpush.msra.mxu1 %v61_v10  ;;  %291 = vmatpush.msra.mxu0 %v44_v11  ;;  %v91_v19 = vld [vmem:[%s3263_s0 + $0x1d8] sm:$0xff]  ;;  %v58_v22 = vld [vmem:[%s3263_s0 + $0xd0] sm:$0xff]  ;;  %v41_v24 = vld [vmem:[%s3263_s0 + $0x48] sm:$0xff] }
   0x9   :  { %350 = vmatpush.msra.mxu3 %v93_v13  ;;  %331 = vmatpush.msra.mxu2 %v76_v12  ;;  %v90_v23 = vld [vmem:[%s3263_s0 + $0x1d0] sm:$0xff]  ;;  %v73_v25 = vld [vmem:[%s3263_s0 + $0x148] sm:$0xff]  ;;  %v40_v28 = vld [vmem:[%s3263_s0 + $0x40] sm:$0xff] }
   0xa   :  { %311 = vmatpush.msra.mxu1 %v60_v14  ;;  %292 = vmatpush.msra.mxu0 %v43_v16  ;;  %v57_v26 = vld [vmem:[%s3263_s0 + $0xc8] sm:$0xff]  ;;  %v72_v29 = vld [vmem:[%s3263_s0 + $0x140] sm:$0xff]  ;;  %v39_v32 = vld [vmem:[%s3263_s0 + $0x38] sm:$0xff] }
   0xb   :  { %351 = vmatpush.msra.mxu3 %v92_v15  ;;  %332 = vmatpush.msra.mxu2 %v75_v17  ;;  %v89_v27 = vld [vmem:[%s3263_s0 + $0x1c8] sm:$0xff]  ;;  %v56_v30 = vld [vmem:[%s3263_s0 + $0xc0] sm:$0xff]  ;;  %v71_v33 = vld [vmem:[%s3263_s0 + $0x138] sm:$0xff] }
   0xc   :  { %312 = vmatpush.msra.mxu1 %v59_v18  ;;  %293 = vmatpush.msra.mxu0 %v42_v20  ;;  %v88_v31 = vld [vmem:[%s3263_s0 + $0x1c0] sm:$0xff]  ;;  %v55_v34 = vld [vmem:[%s3263_s0 + $0xb8] sm:$0xff]  ;;  %v38_v36 = vld [vmem:[%s3263_s0 + $0x30] sm:$0xff] }
   0xd   :  { %352 = vmatpush.msra.mxu3 %v91_v19  ;;  %333 = vmatpush.msra.mxu2 %v74_v21  ;;  %v87_v35 = vld [vmem:[%s3263_s0 + $0x1b8] sm:$0xff]  ;;  %v70_v37 = vld [vmem:[%s3263_s0 + $0x130] sm:$0xff]  ;;  %v37_v40 = vld [vmem:[%s3263_s0 + $0x28] sm:$0xff] }
   0xe   :  { %313 = vmatpush.msra.mxu1 %v58_v22  ;;  %294 = vmatpush.msra.mxu0 %v41_v24  ;;  %v54_v38 = vld [vmem:[%s3263_s0 + $0xb0] sm:$0xff]  ;;  %v69_v41 = vld [vmem:[%s3263_s0 + $0x128] sm:$0xff]  ;;  %v36_v44 = vld [vmem:[%s3263_s0 + $0x20] sm:$0xff] }
   0xf   :  { %353 = vmatpush.msra.mxu3 %v90_v23  ;;  %334 = vmatpush.msra.mxu2 %v73_v25  ;;  %v86_v39 = vld [vmem:[%s3263_s0 + $0x1b0] sm:$0xff]  ;;  %v53_v42 = vld [vmem:[%s3263_s0 + $0xa8] sm:$0xff]  ;;  %v68_v45 = vld [vmem:[%s3263_s0 + $0x120] sm:$0xff] }
  0x10   :  { %314 = vmatpush.msra.mxu1 %v57_v26  ;;  %295 = vmatpush.msra.mxu0 %v40_v28  ;;  %v85_v43 = vld [vmem:[%s3263_s0 + $0x1a8] sm:$0xff]  ;;  %v52_v46 = vld [vmem:[%s3263_s0 + $0xa0] sm:$0xff]  ;;  %v35_v48 = vld [vmem:[%s3263_s0 + $0x18] sm:$0xff] }
  0x11   :  { %354 = vmatpush.msra.mxu3 %v89_v27  ;;  %335 = vmatpush.msra.mxu2 %v72_v29  ;;  %v84_v47 = vld [vmem:[%s3263_s0 + $0x1a0] sm:$0xff]  ;;  %v67_v49 = vld [vmem:[%s3263_s0 + $0x118] sm:$0xff]  ;;  %v34_v52 = vld [vmem:[%s3263_s0 + $0x10] sm:$0xff] }
  0x12   :  { %315 = vmatpush.msra.mxu1 %v56_v30  ;;  %296 = vmatpush.msra.mxu0 %v39_v32  ;;  %v51_v50 = vld [vmem:[%s3263_s0 + $0x98] sm:$0xff]  ;;  %v66_v53 = vld [vmem:[%s3263_s0 + $0x110] sm:$0xff]  ;;  %v33_v56 = vld [vmem:[%s3263_s0 + $0x8] sm:$0xff] }
  0x13   :  { %355 = vmatpush.msra.mxu3 %v88_v31  ;;  %336 = vmatpush.msra.mxu2 %v71_v33  ;;  %v83_v51 = vld [vmem:[%s3263_s0 + $0x198] sm:$0xff]  ;;  %v50_v54 = vld [vmem:[%s3263_s0 + $0x90] sm:$0xff]  ;;  %v65_v57 = vld [vmem:[%s3263_s0 + $0x108] sm:$0xff] }
  0x14   :  { %316 = vmatpush.msra.mxu1 %v55_v34  ;;  %297 = vmatpush.msra.mxu0 %v38_v36  ;;  %v82_v55 = vld [vmem:[%s3263_s0 + $0x190] sm:$0xff]  ;;  %v49_v58 = vld [vmem:[%s3263_s0 + $0x88] sm:$0xff]  ;;  %v32_v60 = vld [vmem:[%s3263_s0] sm:$0xff] }
  0x15   :  { %356 = vmatpush.msra.mxu3 %v87_v35  ;;  %337 = vmatpush.msra.mxu2 %v70_v37  ;;  %v81_v59 = vld [vmem:[%s3263_s0 + $0x188] sm:$0xff]  ;;  %v64_v61 = vld [vmem:[%s3263_s0 + $0x100] sm:$0xff]  ;;  %v111_v62 = vld [vmem:[%s3263_s0 + $0x278] sm:$0xff] }
  0x16   :  { %317 = vmatpush.msra.mxu1 %v54_v38  ;;  %298 = vmatpush.msra.mxu0 %v37_v40  ;;  %v143_v63 = vld [vmem:[%s3263_s0 + $0x378] sm:$0xff]  ;;  %v48_v0 = vld [vmem:[%s3263_s0 + $0x80] sm:$0xff]  ;;  %v110_v2 = vld [vmem:[%s3263_s0 + $0x270] sm:$0xff] }
  0x17   :  { %357 = vmatpush.msra.mxu3 %v86_v39  ;;  %338 = vmatpush.msra.mxu2 %v69_v41  ;;  %v80_v1 = vld [vmem:[%s3263_s0 + $0x180] sm:$0xff]  ;;  %v127_v3 = vld [vmem:[%s3263_s0 + $0x2f8] sm:$0xff]  ;;  %v142_v4 = vld [vmem:[%s3263_s0 + $0x370] sm:$0xff] }
  0x18   :  { %318 = vmatpush.msra.mxu1 %v53_v42  ;;  %299 = vmatpush.msra.mxu0 %v36_v44  ;;  %v159_v5 = vld [vmem:[%s3263_s0 + $0x3f8] sm:$0xff]  ;;  %v109_v6 = vld [vmem:[%s3263_s0 + $0x268] sm:$0xff]  ;;  %v126_v7 = vld [vmem:[%s3263_s0 + $0x2f0] sm:$0xff] }
  0x19   :  { %358 = vmatpush.msra.mxu3 %v85_v43  ;;  %339 = vmatpush.msra.mxu2 %v68_v45  ;;  %v141_v8 = vld [vmem:[%s3263_s0 + $0x368] sm:$0xff]  ;;  %v158_v9 = vld [vmem:[%s3263_s0 + $0x3f0] sm:$0xff]  ;;  %v108_v10 = vld [vmem:[%s3263_s0 + $0x260] sm:$0xff] }
  0x1a   :  { %319 = vmatpush.msra.mxu1 %v52_v46  ;;  %300 = vmatpush.msra.mxu0 %v35_v48  ;;  %v125_v11 = vld [vmem:[%s3263_s0 + $0x2e8] sm:$0xff]  ;;  %v140_v12 = vld [vmem:[%s3263_s0 + $0x360] sm:$0xff]  ;;  %v107_v14 = vld [vmem:[%s3263_s0 + $0x258] sm:$0xff] }
  0x1b   :  { %359 = vmatpush.msra.mxu3 %v84_v47  ;;  %340 = vmatpush.msra.mxu2 %v67_v49  ;;  %v157_v13 = vld [vmem:[%s3263_s0 + $0x3e8] sm:$0xff]  ;;  %v124_v15 = vld [vmem:[%s3263_s0 + $0x2e0] sm:$0xff]  ;;  %v139_v16 = vld [vmem:[%s3263_s0 + $0x358] sm:$0xff] }
  0x1c   :  { %320 = vmatpush.msra.mxu1 %v51_v50  ;;  %301 = vmatpush.msra.mxu0 %v34_v52  ;;  %v156_v17 = vld [vmem:[%s3263_s0 + $0x3e0] sm:$0xff]  ;;  %v106_v18 = vld [vmem:[%s3263_s0 + $0x250] sm:$0xff]  ;;  %v123_v19 = vld [vmem:[%s3263_s0 + $0x2d8] sm:$0xff] }
  0x1d   :  { %360 = vmatpush.msra.mxu3 %v83_v51  ;;  %341 = vmatpush.msra.mxu2 %v66_v53  ;;  %v138_v20 = vld [vmem:[%s3263_s0 + $0x350] sm:$0xff]  ;;  %v155_v21 = vld [vmem:[%s3263_s0 + $0x3d8] sm:$0xff]  ;;  %v105_v22 = vld [vmem:[%s3263_s0 + $0x248] sm:$0xff] }
  0x1e   :  { %321 = vmatpush.msra.mxu1 %v50_v54  ;;  %302 = vmatpush.msra.mxu0 %v33_v56  ;;  %v122_v23 = vld [vmem:[%s3263_s0 + $0x2d0] sm:$0xff]  ;;  %v137_v24 = vld [vmem:[%s3263_s0 + $0x348] sm:$0xff]  ;;  %v104_v26 = vld [vmem:[%s3263_s0 + $0x240] sm:$0xff] }
  0x1f   :  { %361 = vmatpush.msra.mxu3 %v82_v55  ;;  %342 = vmatpush.msra.mxu2 %v65_v57  ;;  %v154_v25 = vld [vmem:[%s3263_s0 + $0x3d0] sm:$0xff]  ;;  %v121_v27 = vld [vmem:[%s3263_s0 + $0x2c8] sm:$0xff]  ;;  %v136_v28 = vld [vmem:[%s3263_s0 + $0x340] sm:$0xff] }
  0x20   :  { %322 = vmatpush.msra.mxu1 %v49_v58  ;;  %303 = vmatpush.msra.mxu0 %v32_v60  ;;  %v153_v29 = vld [vmem:[%s3263_s0 + $0x3c8] sm:$0xff]  ;;  %v103_v30 = vld [vmem:[%s3263_s0 + $0x238] sm:$0xff]  ;;  %v120_v31 = vld [vmem:[%s3263_s0 + $0x2c0] sm:$0xff] }
  0x21   :  { %362 = vmatpush.msra.mxu3 %v81_v59  ;;  %343 = vmatpush.msra.mxu2 %v64_v61  ;;  %v135_v32 = vld [vmem:[%s3263_s0 + $0x338] sm:$0xff]  ;;  %v152_v33 = vld [vmem:[%s3263_s0 + $0x3c0] sm:$0xff]  ;;  %v102_v34 = vld [vmem:[%s3263_s0 + $0x230] sm:$0xff] }
  0x22   :  { %368 = vmatpush.msrb.mxu0 %v111_v62  ;;  %323 = vmatpush.msra.mxu1 %v48_v0  ;;  %v119_v35 = vld [vmem:[%s3263_s0 + $0x2b8] sm:$0xff]  ;;  %v134_v36 = vld [vmem:[%s3263_s0 + $0x330] sm:$0xff]  ;;  %v101_v38 = vld [vmem:[%s3263_s0 + $0x228] sm:$0xff] }
  0x23   :  { %408 = vmatpush.msrb.mxu2 %v143_v63  ;;  %363 = vmatpush.msra.mxu3 %v80_v1  ;;  %v151_v37 = vld [vmem:[%s3263_s0 + $0x3b8] sm:$0xff]  ;;  %v118_v39 = vld [vmem:[%s3263_s0 + $0x2b0] sm:$0xff]  ;;  %v133_v40 = vld [vmem:[%s3263_s0 + $0x328] sm:$0xff] }
  0x24   :  { %369 = vmatpush.msrb.mxu0 %v110_v2  ;;  %388 = vmatpush.msrb.mxu1 %v127_v3  ;;  %v150_v41 = vld [vmem:[%s3263_s0 + $0x3b0] sm:$0xff]  ;;  %v100_v42 = vld [vmem:[%s3263_s0 + $0x220] sm:$0xff]  ;;  %v117_v43 = vld [vmem:[%s3263_s0 + $0x2a8] sm:$0xff] }
  0x25   :  { %409 = vmatpush.msrb.mxu2 %v142_v4  ;;  %428 = vmatpush.msrb.mxu3 %v159_v5  ;;  %v132_v44 = vld [vmem:[%s3263_s0 + $0x320] sm:$0xff]  ;;  %v149_v45 = vld [vmem:[%s3263_s0 + $0x3a8] sm:$0xff]  ;;  %v99_v46 = vld [vmem:[%s3263_s0 + $0x218] sm:$0xff] }
  0x26   :  { %370 = vmatpush.msrb.mxu0 %v109_v6  ;;  %389 = vmatpush.msrb.mxu1 %v126_v7  ;;  %v116_v47 = vld [vmem:[%s3263_s0 + $0x2a0] sm:$0xff]  ;;  %v131_v48 = vld [vmem:[%s3263_s0 + $0x318] sm:$0xff]  ;;  %v98_v50 = vld [vmem:[%s3263_s0 + $0x210] sm:$0xff] }
  0x27   :  { %410 = vmatpush.msrb.mxu2 %v141_v8  ;;  %429 = vmatpush.msrb.mxu3 %v158_v9  ;;  %v148_v49 = vld [vmem:[%s3263_s0 + $0x3a0] sm:$0xff]  ;;  %v115_v51 = vld [vmem:[%s3263_s0 + $0x298] sm:$0xff]  ;;  %v130_v52 = vld [vmem:[%s3263_s0 + $0x310] sm:$0xff] }
  0x28   :  { %371 = vmatpush.msrb.mxu0 %v108_v10  ;;  %390 = vmatpush.msrb.mxu1 %v125_v11  ;;  %v147_v53 = vld [vmem:[%s3263_s0 + $0x398] sm:$0xff]  ;;  %v97_v54 = vld [vmem:[%s3263_s0 + $0x208] sm:$0xff]  ;;  %v114_v55 = vld [vmem:[%s3263_s0 + $0x290] sm:$0xff] }
  0x29   :  { %411 = vmatpush.msrb.mxu2 %v140_v12  ;;  %430 = vmatpush.msrb.mxu3 %v157_v13  ;;  %v129_v56 = vld [vmem:[%s3263_s0 + $0x308] sm:$0xff]  ;;  %v146_v57 = vld [vmem:[%s3263_s0 + $0x390] sm:$0xff]  ;;  %v96_v59 = vld [vmem:[%s3263_s0 + $0x200] sm:$0xff] }
  0x2a   :  { %372 = vmatpush.msrb.mxu0 %v107_v14  ;;  %391 = vmatpush.msrb.mxu1 %v124_v15  ;;  %v17_v58 = vld [vmem:[%s3264_s1 + $0x10] sm:$0xff]  ;;  %v113_v60 = vld [vmem:[%s3263_s0 + $0x288] sm:$0xff]  ;;  %v128_v61 = vld [vmem:[%s3263_s0 + $0x300] sm:$0xff] }
  0x2b   :  { %412 = vmatpush.msrb.mxu2 %v139_v16  ;;  %431 = vmatpush.msrb.mxu3 %v156_v17  ;;  %v145_v62 = vld [vmem:[%s3263_s0 + $0x388] sm:$0xff]  ;;  %v1997_v63 = vld [vmem:[%s3264_s1] sm:$0xff]  ;;  %v18_v0 = vld [vmem:[%s3264_s1 + $0x18] sm:$0xff] }
  0x2c   :  { %373 = vmatpush.msrb.mxu0 %v106_v18  ;;  %392 = vmatpush.msrb.mxu1 %v123_v19  ;;  %v175_v1 = vld [vmem:[%s3263_s0 + $0x478] sm:$0xff]  ;;  %v112_v3 = vld [vmem:[%s3263_s0 + $0x280] sm:$0xff] }
  0x2d   :  { %413 = vmatpush.msrb.mxu2 %v138_v20  ;;  %432 = vmatpush.msrb.mxu3 %v155_v21  ;;  %v207_v2 = vld [vmem:[%s3263_s0 + $0x578] sm:$0xff] }
  0x2e   :  { %374 = vmatpush.msrb.mxu0 %v105_v22  ;;  %393 = vmatpush.msrb.mxu1 %v122_v23 }
  0x2f   :  { %414 = vmatpush.msrb.mxu2 %v137_v24  ;;  %433 = vmatpush.msrb.mxu3 %v154_v25 }
  0x30   :  { %375 = vmatpush.msrb.mxu0 %v104_v26  ;;  %394 = vmatpush.msrb.mxu1 %v121_v27 }
  0x31   :  { %415 = vmatpush.msrb.mxu2 %v136_v28  ;;  %434 = vmatpush.msrb.mxu3 %v153_v29 }
  0x32   :  { %376 = vmatpush.msrb.mxu0 %v103_v30  ;;  %395 = vmatpush.msrb.mxu1 %v120_v31 }
  0x33   :  { %416 = vmatpush.msrb.mxu2 %v135_v32  ;;  %435 = vmatpush.msrb.mxu3 %v152_v33 }
  0x34   :  { %377 = vmatpush.msrb.mxu0 %v102_v34  ;;  %396 = vmatpush.msrb.mxu1 %v119_v35 }
  0x35   :  { %417 = vmatpush.msrb.mxu2 %v134_v36  ;;  %436 = vmatpush.msrb.mxu3 %v151_v37 }
  0x36   :  { %378 = vmatpush.msrb.mxu0 %v101_v38  ;;  %397 = vmatpush.msrb.mxu1 %v118_v39 }
  0x37   :  { %418 = vmatpush.msrb.mxu2 %v133_v40  ;;  %437 = vmatpush.msrb.mxu3 %v150_v41 }
  0x38   :  { %379 = vmatpush.msrb.mxu0 %v100_v42  ;;  %398 = vmatpush.msrb.mxu1 %v117_v43 }
  0x39   :  { %419 = vmatpush.msrb.mxu2 %v132_v44  ;;  %438 = vmatpush.msrb.mxu3 %v149_v45 }
  0x3a   :  { %380 = vmatpush.msrb.mxu0 %v99_v46  ;;  %399 = vmatpush.msrb.mxu1 %v116_v47 }
  0x3b   :  { %420 = vmatpush.msrb.mxu2 %v131_v48  ;;  %439 = vmatpush.msrb.mxu3 %v148_v49 }
  0x3c   :  { %381 = vmatpush.msrb.mxu0 %v98_v50  ;;  %400 = vmatpush.msrb.mxu1 %v115_v51 }
  0x3d   :  { %421 = vmatpush.msrb.mxu2 %v130_v52  ;;  %440 = vmatpush.msrb.mxu3 %v147_v53 }
  0x3e   :  { %382 = vmatpush.msrb.mxu0 %v97_v54  ;;  %401 = vmatpush.msrb.mxu1 %v114_v55 }
  0x3f   :  { %422 = vmatpush.msrb.mxu2 %v129_v56  ;;  %441 = vmatpush.msrb.mxu3 %v146_v57 }
  0x40   :  { %344 = vmatmul.f32.vlgmr.msra.gmra.mxu2 %v17_v58  ;;  %383 = vmatpush.msrb.mxu0 %v96_v59 }
  0x41   :  { %402 = vmatpush.msrb.mxu1 %v113_v60  ;;  %423 = vmatpush.msrb.mxu2 %v128_v61 }
  0x42   :  { %8 = vsyncpa [#allocation3], 0  ;;  %442 = vmatpush.msrb.mxu3 %v145_v62  ;;  %304 = vmatmul.f32.vlgmr.msra.gmra.mxu0 %v1997_v63  ;;  %v144_v4 = vld [vmem:[%s3263_s0 + $0x380] sm:$0xff]  ;;  %v2018_v5 = vld [vmem:[%s3264_s1 + $0x8] sm:$0xff]  ;;  %vm608_vm0 = vcmask 400384   ;;  %vm1242_vm1 = vcmask 1040384  }
  0x43   :  { %364 = vmatmul.f32.vlgmr.msra.gmra.mxu3 %v18_v0  ;;  %448 = vmatpush.msra.mxu0 %v175_v1  ;;  %v174_v6 = vld [vmem:[%s3263_s0 + $0x470] sm:$0xff]  ;;  %v191_v7 = vld [vmem:[%s3263_s0 + $0x4f8] sm:$0xff]  ;;  %v173_v10 = vld [vmem:[%s3263_s0 + $0x468] sm:$0xff]  ;;  %vm1244_vm2 = vcmask 58368   ;;  %s1277_s17 = sshll.u32 %s3266_s3, 4  ;;  %s1278_s17 = int_to_ptr.hbm [resolvable:$true] %s1277_s17 }
  0x44   :  { %488 = vmatpush.msra.mxu2 %v207_v2  ;;  %403 = vmatpush.msrb.mxu1 %v112_v3  ;;  %v206_v8 = vld [vmem:[%s3263_s0 + $0x570] sm:$0xff]  ;;  %v223_v9 = vld [vmem:[%s3263_s0 + $0x5f8] sm:$0xff]  ;;  %v205_v12 = vld [vmem:[%s3263_s0 + $0x568] sm:$0xff] }
  0x45   :  { %443 = vmatpush.msrb.mxu3 %v144_v4  ;;  %324 = vmatmul.f32.vlgmr.msra.gmra.mxu1 %v2018_v5  ;;  %v190_v11 = vld [vmem:[%s3263_s0 + $0x4f0] sm:$0xff]  ;;  %v172_v15 = vld [vmem:[%s3263_s0 + $0x460] sm:$0xff]  ;;  %v189_v16 = vld [vmem:[%s3263_s0 + $0x4e8] sm:$0xff] }
  0x46   :  { %449 = vmatpush.msra.mxu0 %v174_v6  ;;  %468 = vmatpush.msra.mxu1 %v191_v7  ;;  %v222_v13 = vld [vmem:[%s3263_s0 + $0x5f0] sm:$0xff]  ;;  %v204_v17 = vld [vmem:[%s3263_s0 + $0x560] sm:$0xff]  ;;  %v221_v18 = vld [vmem:[%s3263_s0 + $0x5e8] sm:$0xff] }
  0x47   :  { %489 = vmatpush.msra.mxu2 %v206_v8  ;;  %508 = vmatpush.msra.mxu3 %v223_v9  ;;  %v21_v14 = vld [vmem:[%s3264_s1 + $0x30] sm:$0xff]  ;;  %v19_v19 = vld [vmem:[%s3264_s1 + $0x20] sm:$0xff]  ;;  %v22_v20 = vld [vmem:[%s3264_s1 + $0x38] sm:$0xff] }
  0x48   :  { %450 = vmatpush.msra.mxu0 %v173_v10  ;;  %469 = vmatpush.msra.mxu1 %v190_v11  ;;  %v171_v21 = vld [vmem:[%s3263_s0 + $0x458] sm:$0xff]  ;;  %v188_v22 = vld [vmem:[%s3263_s0 + $0x4e0] sm:$0xff]  ;;  %v20_v25 = vld [vmem:[%s3264_s1 + $0x28] sm:$0xff] }
  0x49   :  { %490 = vmatpush.msra.mxu2 %v205_v12  ;;  %509 = vmatpush.msra.mxu3 %v222_v13  ;;  %v203_v23 = vld [vmem:[%s3263_s0 + $0x558] sm:$0xff]  ;;  %v220_v24 = vld [vmem:[%s3263_s0 + $0x5e0] sm:$0xff]  ;;  %v170_v26 = vld [vmem:[%s3263_s0 + $0x450] sm:$0xff] }
  0x4a   :  { %424 = vmatmul.f32.vlgmr.msrb.gmra.mxu2 %v21_v14  ;;  %451 = vmatpush.msra.mxu0 %v172_v15  ;;  %v187_v27 = vld [vmem:[%s3263_s0 + $0x4d8] sm:$0xff]  ;;  %v202_v28 = vld [vmem:[%s3263_s0 + $0x550] sm:$0xff]  ;;  %v169_v30 = vld [vmem:[%s3263_s0 + $0x448] sm:$0xff] }
  0x4b   :  { %470 = vmatpush.msra.mxu1 %v189_v16  ;;  %491 = vmatpush.msra.mxu2 %v204_v17  ;;  %v219_v29 = vld [vmem:[%s3263_s0 + $0x5d8] sm:$0xff]  ;;  %v186_v31 = vld [vmem:[%s3263_s0 + $0x4d0] sm:$0xff]  ;;  %v201_v32 = vld [vmem:[%s3263_s0 + $0x548] sm:$0xff] }
  0x4c   :  { %510 = vmatpush.msra.mxu3 %v221_v18  ;;  %384 = vmatmul.f32.vlgmr.msrb.gmra.mxu0 %v19_v19  ;;  %v218_v33 = vld [vmem:[%s3263_s0 + $0x5d0] sm:$0xff]  ;;  %v168_v34 = vld [vmem:[%s3263_s0 + $0x440] sm:$0xff]  ;;  %v185_v35 = vld [vmem:[%s3263_s0 + $0x4c8] sm:$0xff] }
  0x4d   :  { %444 = vmatmul.f32.vlgmr.msrb.gmra.mxu3 %v22_v20  ;;  %452 = vmatpush.msra.mxu0 %v171_v21  ;;  %v200_v36 = vld [vmem:[%s3263_s0 + $0x540] sm:$0xff]  ;;  %v217_v37 = vld [vmem:[%s3263_s0 + $0x5c8] sm:$0xff]  ;;  %v167_v38 = vld [vmem:[%s3263_s0 + $0x438] sm:$0xff] }
  0x4e   :  { %471 = vmatpush.msra.mxu1 %v188_v22  ;;  %492 = vmatpush.msra.mxu2 %v203_v23  ;;  %v184_v39 = vld [vmem:[%s3263_s0 + $0x4c0] sm:$0xff]  ;;  %v199_v40 = vld [vmem:[%s3263_s0 + $0x538] sm:$0xff]  ;;  %v166_v42 = vld [vmem:[%s3263_s0 + $0x430] sm:$0xff] }
  0x4f   :  { %511 = vmatpush.msra.mxu3 %v220_v24  ;;  %404 = vmatmul.f32.vlgmr.msrb.gmra.mxu1 %v20_v25  ;;  %v216_v41 = vld [vmem:[%s3263_s0 + $0x5c0] sm:$0xff]  ;;  %v183_v43 = vld [vmem:[%s3263_s0 + $0x4b8] sm:$0xff]  ;;  %v198_v44 = vld [vmem:[%s3263_s0 + $0x530] sm:$0xff] }
  0x50   :  { %453 = vmatpush.msra.mxu0 %v170_v26  ;;  %472 = vmatpush.msra.mxu1 %v187_v27  ;;  %v215_v45 = vld [vmem:[%s3263_s0 + $0x5b8] sm:$0xff]  ;;  %v165_v46 = vld [vmem:[%s3263_s0 + $0x428] sm:$0xff]  ;;  %v182_v47 = vld [vmem:[%s3263_s0 + $0x4b0] sm:$0xff] }
  0x51   :  { %493 = vmatpush.msra.mxu2 %v202_v28  ;;  %512 = vmatpush.msra.mxu3 %v219_v29  ;;  %v197_v48 = vld [vmem:[%s3263_s0 + $0x528] sm:$0xff]  ;;  %v214_v49 = vld [vmem:[%s3263_s0 + $0x5b0] sm:$0xff]  ;;  %v164_v50 = vld [vmem:[%s3263_s0 + $0x420] sm:$0xff] }
  0x52   :  { %454 = vmatpush.msra.mxu0 %v169_v30  ;;  %473 = vmatpush.msra.mxu1 %v186_v31  ;;  %v181_v51 = vld [vmem:[%s3263_s0 + $0x4a8] sm:$0xff]  ;;  %v196_v52 = vld [vmem:[%s3263_s0 + $0x520] sm:$0xff]  ;;  %v163_v54 = vld [vmem:[%s3263_s0 + $0x418] sm:$0xff] }
  0x53   :  { %494 = vmatpush.msra.mxu2 %v201_v32  ;;  %513 = vmatpush.msra.mxu3 %v218_v33  ;;  %v213_v53 = vld [vmem:[%s3263_s0 + $0x5a8] sm:$0xff]  ;;  %v180_v55 = vld [vmem:[%s3263_s0 + $0x4a0] sm:$0xff]  ;;  %v195_v56 = vld [vmem:[%s3263_s0 + $0x518] sm:$0xff] }
  0x54   :  { %455 = vmatpush.msra.mxu0 %v168_v34  ;;  %474 = vmatpush.msra.mxu1 %v185_v35  ;;  %v212_v57 = vld [vmem:[%s3263_s0 + $0x5a0] sm:$0xff]  ;;  %v162_v58 = vld [vmem:[%s3263_s0 + $0x410] sm:$0xff]  ;;  %v179_v59 = vld [vmem:[%s3263_s0 + $0x498] sm:$0xff] }
  0x55   :  { %495 = vmatpush.msra.mxu2 %v200_v36  ;;  %514 = vmatpush.msra.mxu3 %v217_v37  ;;  %v194_v60 = vld [vmem:[%s3263_s0 + $0x510] sm:$0xff]  ;;  %v211_v61 = vld [vmem:[%s3263_s0 + $0x598] sm:$0xff]  ;;  %v161_v62 = vld [vmem:[%s3263_s0 + $0x408] sm:$0xff] }
  0x56   :  { %456 = vmatpush.msra.mxu0 %v167_v38  ;;  %475 = vmatpush.msra.mxu1 %v184_v39  ;;  %v178_v0 = vld [vmem:[%s3263_s0 + $0x490] sm:$0xff]  ;;  %v193_v1 = vld [vmem:[%s3263_s0 + $0x508] sm:$0xff]  ;;  %v160_v3 = vld [vmem:[%s3263_s0 + $0x400] sm:$0xff] }
  0x57   :  { %496 = vmatpush.msra.mxu2 %v199_v40  ;;  %515 = vmatpush.msra.mxu3 %v216_v41  ;;  %v210_v2 = vld [vmem:[%s3263_s0 + $0x590] sm:$0xff]  ;;  %v177_v4 = vld [vmem:[%s3263_s0 + $0x488] sm:$0xff]  ;;  %v192_v6 = vld [vmem:[%s3263_s0 + $0x500] sm:$0xff] }
  0x58   :  { %457 = vmatpush.msra.mxu0 %v166_v42  ;;  %476 = vmatpush.msra.mxu1 %v183_v43  ;;  %v209_v7 = vld [vmem:[%s3263_s0 + $0x588] sm:$0xff]  ;;  %v23_v8 = vld [vmem:[%s3264_s1 + $0x40] sm:$0xff]  ;;  %v25_v9 = vld [vmem:[%s3264_s1 + $0x50] sm:$0xff] }
  0x59   :  { %497 = vmatpush.msra.mxu2 %v198_v44  ;;  %516 = vmatpush.msra.mxu3 %v215_v45  ;;  %v239_v10 = vld [vmem:[%s3263_s0 + $0x678] sm:$0xff]  ;;  %v176_v12 = vld [vmem:[%s3263_s0 + $0x480] sm:$0xff]  ;;  %v24_v14 = vld [vmem:[%s3264_s1 + $0x48] sm:$0xff] }
  0x5a   :  { %458 = vmatpush.msra.mxu0 %v165_v46  ;;  %477 = vmatpush.msra.mxu1 %v182_v47  ;;  %v271_v11 = vld [vmem:[%s3263_s0 + $0x778] sm:$0xff]  ;;  %v208_v13 = vld [vmem:[%s3263_s0 + $0x580] sm:$0xff]  ;;  %v238_v16 = vld [vmem:[%s3263_s0 + $0x670] sm:$0xff] }
  0x5b   :  { %498 = vmatpush.msra.mxu2 %v197_v48  ;;  %517 = vmatpush.msra.mxu3 %v214_v49  ;;  %v26_v15 = vld [vmem:[%s3264_s1 + $0x58] sm:$0xff]  ;;  %v270_v18 = vld [vmem:[%s3263_s0 + $0x770] sm:$0xff]  ;;  %v237_v20 = vld [vmem:[%s3263_s0 + $0x668] sm:$0xff] }
  0x5c   :  { %459 = vmatpush.msra.mxu0 %v164_v50  ;;  %478 = vmatpush.msra.mxu1 %v181_v51  ;;  %v255_v17 = vld [vmem:[%s3263_s0 + $0x6f8] sm:$0xff]  ;;  %v254_v21 = vld [vmem:[%s3263_s0 + $0x6f0] sm:$0xff]  ;;  %v269_v22 = vld [vmem:[%s3263_s0 + $0x768] sm:$0xff] }
  0x5d   :  { %499 = vmatpush.msra.mxu2 %v196_v52  ;;  %518 = vmatpush.msra.mxu3 %v213_v53  ;;  %v287_v19 = vld [vmem:[%s3263_s0 + $0x7f8] sm:$0xff]  ;;  %v286_v23 = vld [vmem:[%s3263_s0 + $0x7f0] sm:$0xff]  ;;  %v236_v24 = vld [vmem:[%s3263_s0 + $0x660] sm:$0xff] }
  0x5e   :  { %460 = vmatpush.msra.mxu0 %v163_v54  ;;  %479 = vmatpush.msra.mxu1 %v180_v55  ;;  %v253_v25 = vld [vmem:[%s3263_s0 + $0x6e8] sm:$0xff]  ;;  %v268_v26 = vld [vmem:[%s3263_s0 + $0x760] sm:$0xff]  ;;  %v235_v28 = vld [vmem:[%s3263_s0 + $0x658] sm:$0xff] }
  0x5f   :  { %500 = vmatpush.msra.mxu2 %v195_v56  ;;  %519 = vmatpush.msra.mxu3 %v212_v57  ;;  %v285_v27 = vld [vmem:[%s3263_s0 + $0x7e8] sm:$0xff]  ;;  %v252_v29 = vld [vmem:[%s3263_s0 + $0x6e0] sm:$0xff]  ;;  %v267_v30 = vld [vmem:[%s3263_s0 + $0x758] sm:$0xff] }
  0x60   :  { %461 = vmatpush.msra.mxu0 %v162_v58  ;;  %480 = vmatpush.msra.mxu1 %v179_v59  ;;  %v284_v31 = vld [vmem:[%s3263_s0 + $0x7e0] sm:$0xff]  ;;  %v234_v32 = vld [vmem:[%s3263_s0 + $0x650] sm:$0xff]  ;;  %v251_v33 = vld [vmem:[%s3263_s0 + $0x6d8] sm:$0xff] }
  0x61   :  { %501 = vmatpush.msra.mxu2 %v194_v60  ;;  %520 = vmatpush.msra.mxu3 %v211_v61  ;;  %v266_v34 = vld [vmem:[%s3263_s0 + $0x750] sm:$0xff]  ;;  %v283_v35 = vld [vmem:[%s3263_s0 + $0x7d8] sm:$0xff]  ;;  %v233_v36 = vld [vmem:[%s3263_s0 + $0x648] sm:$0xff] }
  0x62   :  { %462 = vmatpush.msra.mxu0 %v161_v62  ;;  %481 = vmatpush.msra.mxu1 %v178_v0  ;;  %v250_v37 = vld [vmem:[%s3263_s0 + $0x6d0] sm:$0xff]  ;;  %v265_v38 = vld [vmem:[%s3263_s0 + $0x748] sm:$0xff]  ;;  %v232_v40 = vld [vmem:[%s3263_s0 + $0x640] sm:$0xff] }
  0x63   :  { %502 = vmatpush.msra.mxu2 %v193_v1  ;;  %521 = vmatpush.msra.mxu3 %v210_v2  ;;  %v282_v39 = vld [vmem:[%s3263_s0 + $0x7d0] sm:$0xff]  ;;  %v249_v41 = vld [vmem:[%s3263_s0 + $0x6c8] sm:$0xff]  ;;  %v264_v42 = vld [vmem:[%s3263_s0 + $0x740] sm:$0xff] }
  0x64   :  { %463 = vmatpush.msra.mxu0 %v160_v3  ;;  %482 = vmatpush.msra.mxu1 %v177_v4  ;;  %v281_v43 = vld [vmem:[%s3263_s0 + $0x7c8] sm:$0xff]  ;;  %v231_v44 = vld [vmem:[%s3263_s0 + $0x638] sm:$0xff]  ;;  %v248_v45 = vld [vmem:[%s3263_s0 + $0x6c0] sm:$0xff] }
  0x65   :  { %503 = vmatpush.msra.mxu2 %v192_v6  ;;  %522 = vmatpush.msra.mxu3 %v209_v7  ;;  %v263_v46 = vld [vmem:[%s3263_s0 + $0x738] sm:$0xff]  ;;  %v280_v47 = vld [vmem:[%s3263_s0 + $0x7c0] sm:$0xff]  ;;  %v230_v48 = vld [vmem:[%s3263_s0 + $0x630] sm:$0xff] }
  0x66   :  { %464 = vmatmul.f32.vlgmr.msra.gmra.mxu0 %v23_v8  ;;  %504 = vmatmul.f32.vlgmr.msra.gmra.mxu2 %v25_v9  ;;  %v247_v49 = vld [vmem:[%s3263_s0 + $0x6b8] sm:$0xff]  ;;  %v262_v50 = vld [vmem:[%s3263_s0 + $0x730] sm:$0xff]  ;;  %v229_v52 = vld [vmem:[%s3263_s0 + $0x628] sm:$0xff] }
  0x67   :  { %528 = vmatpush.msrb.mxu0 %v239_v10  ;;  %568 = vmatpush.msrb.mxu2 %v271_v11  ;;  %v279_v51 = vld [vmem:[%s3263_s0 + $0x7b8] sm:$0xff]  ;;  %v246_v53 = vld [vmem:[%s3263_s0 + $0x6b0] sm:$0xff]  ;;  %v261_v54 = vld [vmem:[%s3263_s0 + $0x728] sm:$0xff] }
  0x68   :  { %483 = vmatpush.msra.mxu1 %v176_v12  ;;  %523 = vmatpush.msra.mxu3 %v208_v13  ;;  %v278_v55 = vld [vmem:[%s3263_s0 + $0x7b0] sm:$0xff]  ;;  %v228_v56 = vld [vmem:[%s3263_s0 + $0x620] sm:$0xff]  ;;  %v245_v57 = vld [vmem:[%s3263_s0 + $0x6a8] sm:$0xff] }
  0x69   :  { %484 = vmatmul.f32.vlgmr.msra.gmra.mxu1 %v24_v14  ;;  %524 = vmatmul.f32.vlgmr.msra.gmra.mxu3 %v26_v15  ;;  %v260_v58 = vld [vmem:[%s3263_s0 + $0x720] sm:$0xff]  ;;  %v277_v59 = vld [vmem:[%s3263_s0 + $0x7a8] sm:$0xff]  ;;  %v227_v60 = vld [vmem:[%s3263_s0 + $0x618] sm:$0xff] }
  0x6a   :  { %529 = vmatpush.msrb.mxu0 %v238_v16  ;;  %548 = vmatpush.msrb.mxu1 %v255_v17  ;;  %v244_v61 = vld [vmem:[%s3263_s0 + $0x6a0] sm:$0xff]  ;;  %v259_v62 = vld [vmem:[%s3263_s0 + $0x718] sm:$0xff]  ;;  %v226_v1 = vld [vmem:[%s3263_s0 + $0x610] sm:$0xff] }
  0x6b   :  { %569 = vmatpush.msrb.mxu2 %v270_v18  ;;  %588 = vmatpush.msrb.mxu3 %v287_v19  ;;  %v276_v0 = vld [vmem:[%s3263_s0 + $0x7a0] sm:$0xff]  ;;  %v243_v2 = vld [vmem:[%s3263_s0 + $0x698] sm:$0xff]  ;;  %v258_v3 = vld [vmem:[%s3263_s0 + $0x710] sm:$0xff] }
  0x6c   :  { %530 = vmatpush.msrb.mxu0 %v237_v20  ;;  %549 = vmatpush.msrb.mxu1 %v254_v21  ;;  %v275_v4 = vld [vmem:[%s3263_s0 + $0x798] sm:$0xff]  ;;  %v225_v6 = vld [vmem:[%s3263_s0 + $0x608] sm:$0xff]  ;;  %v242_v7 = vld [vmem:[%s3263_s0 + $0x690] sm:$0xff] }
  0x6d   :  { %570 = vmatpush.msrb.mxu2 %v269_v22  ;;  %589 = vmatpush.msrb.mxu3 %v286_v23  ;;  %v257_v8 = vld [vmem:[%s3263_s0 + $0x708] sm:$0xff]  ;;  %v274_v9 = vld [vmem:[%s3263_s0 + $0x790] sm:$0xff]  ;;  %v224_v10 = vld [vmem:[%s3263_s0 + $0x600] sm:$0xff] }
  0x6e   :  { %531 = vmatpush.msrb.mxu0 %v236_v24  ;;  %550 = vmatpush.msrb.mxu1 %v253_v25  ;;  %v241_v11 = vld [vmem:[%s3263_s0 + $0x688] sm:$0xff]  ;;  %v256_v12 = vld [vmem:[%s3263_s0 + $0x700] sm:$0xff]  ;;  %v29_v15 = vld [vmem:[%s3264_s1 + $0x70] sm:$0xff] }
  0x6f   :  { %571 = vmatpush.msrb.mxu2 %v268_v26  ;;  %590 = vmatpush.msrb.mxu3 %v285_v27  ;;  %v273_v13 = vld [vmem:[%s3263_s0 + $0x788] sm:$0xff]  ;;  %v27_v14 = vld [vmem:[%s3264_s1 + $0x60] sm:$0xff]  ;;  %v30_v19 = vld [vmem:[%s3264_s1 + $0x78] sm:$0xff] }
  0x70   :  { %532 = vmatpush.msrb.mxu0 %v235_v28  ;;  %551 = vmatpush.msrb.mxu1 %v252_v29  ;;  %v240_v16 = vld [vmem:[%s3263_s0 + $0x680] sm:$0xff]  ;;  %v2432_v18 = vld [vmem:[%s3264_s1 + $0x68] sm:$0xff]  ;;  %v1319_v20 = vld [vmem:[%s3263_s0 + $0x8f8] sm:$0xff] }
  0x71   :  { %572 = vmatpush.msrb.mxu2 %v267_v30  ;;  %591 = vmatpush.msrb.mxu3 %v284_v31  ;;  %v272_v17 = vld [vmem:[%s3263_s0 + $0x780] sm:$0xff]  ;;  %v1318_v21 = vld [vmem:[%s3263_s0 + $0x8f0] sm:$0xff]  ;;  %v1335_v22 = vld [vmem:[%s3263_s0 + $0x978] sm:$0xff] }
  0x72   :  { %533 = vmatpush.msrb.mxu0 %v234_v32  ;;  %552 = vmatpush.msrb.mxu1 %v251_v33  ;;  %v1303_v23 = vld [vmem:[%s3263_s0 + $0x878] sm:$0xff]  ;;  %v1334_v24 = vld [vmem:[%s3263_s0 + $0x970] sm:$0xff]  ;;  %v1317_v25 = vld [vmem:[%s3263_s0 + $0x8e8] sm:$0xff] }
  0x73   :  { %573 = vmatpush.msrb.mxu2 %v266_v34  ;;  %592 = vmatpush.msrb.mxu3 %v283_v35  ;;  %v1302_v26 = vld [vmem:[%s3263_s0 + $0x870] sm:$0xff]  ;;  %v1333_v27 = vld [vmem:[%s3263_s0 + $0x968] sm:$0xff]  ;;  %v1316_v29 = vld [vmem:[%s3263_s0 + $0x8e0] sm:$0xff] }
  0x74   :  { %534 = vmatpush.msrb.mxu0 %v233_v36  ;;  %553 = vmatpush.msrb.mxu1 %v250_v37  ;;  %v1301_v28 = vld [vmem:[%s3263_s0 + $0x868] sm:$0xff]  ;;  %v1332_v30 = vld [vmem:[%s3263_s0 + $0x960] sm:$0xff]  ;;  %v1315_v32 = vld [vmem:[%s3263_s0 + $0x8d8] sm:$0xff] }
  0x75   :  { %574 = vmatpush.msrb.mxu2 %v265_v38  ;;  %593 = vmatpush.msrb.mxu3 %v282_v39  ;;  %v1300_v31 = vld [vmem:[%s3263_s0 + $0x860] sm:$0xff]  ;;  %v1331_v33 = vld [vmem:[%s3263_s0 + $0x958] sm:$0xff]  ;;  %v1314_v35 = vld [vmem:[%s3263_s0 + $0x8d0] sm:$0xff] }
  0x76   :  { %535 = vmatpush.msrb.mxu0 %v232_v40  ;;  %554 = vmatpush.msrb.mxu1 %v249_v41  ;;  %v1299_v34 = vld [vmem:[%s3263_s0 + $0x858] sm:$0xff]  ;;  %v1330_v36 = vld [vmem:[%s3263_s0 + $0x950] sm:$0xff]  ;;  %v1313_v38 = vld [vmem:[%s3263_s0 + $0x8c8] sm:$0xff] }
  0x77   :  { %575 = vmatpush.msrb.mxu2 %v264_v42  ;;  %594 = vmatpush.msrb.mxu3 %v281_v43  ;;  %v1298_v37 = vld [vmem:[%s3263_s0 + $0x850] sm:$0xff]  ;;  %v1329_v39 = vld [vmem:[%s3263_s0 + $0x948] sm:$0xff]  ;;  %v1312_v41 = vld [vmem:[%s3263_s0 + $0x8c0] sm:$0xff] }
  0x78   :  { %536 = vmatpush.msrb.mxu0 %v231_v44  ;;  %555 = vmatpush.msrb.mxu1 %v248_v45  ;;  %v1297_v40 = vld [vmem:[%s3263_s0 + $0x848] sm:$0xff]  ;;  %v1328_v42 = vld [vmem:[%s3263_s0 + $0x940] sm:$0xff]  ;;  %v1311_v44 = vld [vmem:[%s3263_s0 + $0x8b8] sm:$0xff] }
  0x79   :  { %576 = vmatpush.msrb.mxu2 %v263_v46  ;;  %595 = vmatpush.msrb.mxu3 %v280_v47  ;;  %v1296_v43 = vld [vmem:[%s3263_s0 + $0x840] sm:$0xff]  ;;  %v1327_v45 = vld [vmem:[%s3263_s0 + $0x938] sm:$0xff] }
  0x7a   :  { %537 = vmatpush.msrb.mxu0 %v230_v48  ;;  %556 = vmatpush.msrb.mxu1 %v247_v49  ;;  %v1295_v46 = vld [vmem:[%s3263_s0 + $0x838] sm:$0xff]  ;;  %v1310_v48 = vld [vmem:[%s3263_s0 + $0x8b0] sm:$0xff] }
  0x7b   :  { %577 = vmatpush.msrb.mxu2 %v262_v50  ;;  %596 = vmatpush.msrb.mxu3 %v279_v51  ;;  %v1326_v49 = vld [vmem:[%s3263_s0 + $0x930] sm:$0xff]  ;;  %v1309_v51 = vld [vmem:[%s3263_s0 + $0x8a8] sm:$0xff] }
  0x7c   :  { %538 = vmatpush.msrb.mxu0 %v229_v52  ;;  %557 = vmatpush.msrb.mxu1 %v246_v53 }
  0x7d   :  { %578 = vmatpush.msrb.mxu2 %v261_v54  ;;  %597 = vmatpush.msrb.mxu3 %v278_v55 }
  0x7e   :  { %539 = vmatpush.msrb.mxu0 %v228_v56  ;;  %558 = vmatpush.msrb.mxu1 %v245_v57  ;;  %v1294_v56 = vld [vmem:[%s3263_s0 + $0x830] sm:$0xff]  ;;  %v1308_v57 = vld [vmem:[%s3263_s0 + $0x8a0] sm:$0xff] }
  0x7f   :  { %579 = vmatpush.msrb.mxu2 %v260_v58  ;;  %598 = vmatpush.msrb.mxu3 %v277_v59  ;;  %v1325_v58 = vld [vmem:[%s3263_s0 + $0x928] sm:$0xff] }
  0x80   :  { %540 = vmatpush.msrb.mxu0 %v227_v60  ;;  %559 = vmatpush.msrb.mxu1 %v244_v61  ;;  %v1293_v59 = vld [vmem:[%s3263_s0 + $0x828] sm:$0xff]  ;;  %v1307_v60 = vld [vmem:[%s3263_s0 + $0x898] sm:$0xff]  ;;  %v1324_v61 = vld [vmem:[%s3263_s0 + $0x920] sm:$0xff] }
  0x81   :  { %580 = vmatpush.msrb.mxu2 %v259_v62  ;;  %599 = vmatpush.msrb.mxu3 %v276_v0  ;;  %v1292_v0 = vld [vmem:[%s3263_s0 + $0x820] sm:$0xff] }
  0x82   :  { %541 = vmatpush.msrb.mxu0 %v226_v1  ;;  %560 = vmatpush.msrb.mxu1 %v243_v2  ;;  %v1306_v1 = vld [vmem:[%s3263_s0 + $0x890] sm:$0xff]  ;;  %v1323_v2 = vld [vmem:[%s3263_s0 + $0x918] sm:$0xff] }
  0x83   :  { %581 = vmatpush.msrb.mxu2 %v258_v3  ;;  %600 = vmatpush.msrb.mxu3 %v275_v4  ;;  %v1291_v4 = vld [vmem:[%s3263_s0 + $0x818] sm:$0xff] }
  0x84   :  { %542 = vmatpush.msrb.mxu0 %v225_v6  ;;  %561 = vmatpush.msrb.mxu1 %v242_v7  ;;  %v1305_v6 = vld [vmem:[%s3263_s0 + $0x888] sm:$0xff]  ;;  %v1322_v7 = vld [vmem:[%s3263_s0 + $0x910] sm:$0xff] }
  0x85   :  { %582 = vmatpush.msrb.mxu2 %v257_v8  ;;  %601 = vmatpush.msrb.mxu3 %v274_v9 }
  0x86   :  { %543 = vmatpush.msrb.mxu0 %v224_v10  ;;  %562 = vmatpush.msrb.mxu1 %v241_v11  ;;  %v1290_v10 = vld [vmem:[%s3263_s0 + $0x810] sm:$0xff]  ;;  %v1304_v11 = vld [vmem:[%s3263_s0 + $0x880] sm:$0xff] }
  0x87   :  { %583 = vmatpush.msrb.mxu2 %v256_v12  ;;  %602 = vmatpush.msrb.mxu3 %v273_v13  ;;  %v1321_v12 = vld [vmem:[%s3263_s0 + $0x908] sm:$0xff]  ;;  %v1383_v13 = vld [vmem:[%s3263_s0 + $0xaf8] sm:$0xff] }
  0x88   :  { %544 = vmatmul.f32.vlgmr.msrb.gmra.mxu0 %v27_v14  ;;  %584 = vmatmul.f32.vlgmr.msrb.gmra.mxu2 %v29_v15  ;;  %v1289_v14 = vld [vmem:[%s3263_s0 + $0x808] sm:$0xff]  ;;  %v1320_v15 = vld [vmem:[%s3263_s0 + $0x900] sm:$0xff] }
  0x89   :  { %563 = vmatpush.msrb.mxu1 %v240_v16  ;;  %603 = vmatpush.msrb.mxu3 %v272_v17  ;;  %v1382_v17 = vld [vmem:[%s3263_s0 + $0xaf0] sm:$0xff] }
  0x8a   :  { %564 = vmatmul.f32.vlgmr.msrb.gmra.mxu1 %v2432_v18  ;;  %604 = vmatmul.f32.vlgmr.msrb.gmra.mxu3 %v30_v19  ;;  %v1399_v19 = vld [vmem:[%s3263_s0 + $0xb78] sm:$0xff] }
  0x8b   :  { %914 = vmatpush.msra.mxu2 %v1319_v20  ;;  %934 = vmatpush.msra.mxu3 %v1335_v22  ;;  %v1367_v22 = vld [vmem:[%s3263_s0 + $0xa78] sm:$0xff] }
  0x8c   :  { %894 = vmatpush.msra.mxu1 %v1303_v23  ;;  %v1381_v23 = vld [vmem:[%s3263_s0 + $0xae8] sm:$0xff] }
  0x8d   :  { %915 = vmatpush.msra.mxu2 %v1318_v21  ;;  %935 = vmatpush.msra.mxu3 %v1334_v24  ;;  %v1288_v21 = vld [vmem:[%s3263_s0 + $0x800] sm:$0xff] }
  0x8e   :  { %895 = vmatpush.msra.mxu1 %v1302_v26  ;;  %v1380_v26 = vld [vmem:[%s3263_s0 + $0xae0] sm:$0xff] }
  0x8f   :  { %916 = vmatpush.msra.mxu2 %v1317_v25  ;;  %936 = vmatpush.msra.mxu3 %v1333_v27  ;;  %v1366_v25 = vld [vmem:[%s3263_s0 + $0xa70] sm:$0xff]  ;;  %v1397_v27 = vld [vmem:[%s3263_s0 + $0xb68] sm:$0xff] }
  0x90   :  { %896 = vmatpush.msra.mxu1 %v1301_v28 }
  0x91   :  { %917 = vmatpush.msra.mxu2 %v1316_v29  ;;  %937 = vmatpush.msra.mxu3 %v1332_v30  ;;  %v1365_v29 = vld [vmem:[%s3263_s0 + $0xa68] sm:$0xff]  ;;  %v1379_v30 = vld [vmem:[%s3263_s0 + $0xad8] sm:$0xff] }
  0x92   :  { %897 = vmatpush.msra.mxu1 %v1300_v31  ;;  %v1396_v31 = vld [vmem:[%s3263_s0 + $0xb60] sm:$0xff] }
  0x93   :  { %918 = vmatpush.msra.mxu2 %v1315_v32  ;;  %938 = vmatpush.msra.mxu3 %v1331_v33  ;;  %v1364_v33 = vld [vmem:[%s3263_s0 + $0xa60] sm:$0xff] }
  0x94   :  { %898 = vmatpush.msra.mxu1 %v1299_v34  ;;  %v1378_v34 = vld [vmem:[%s3263_s0 + $0xad0] sm:$0xff] }
  0x95   :  { %919 = vmatpush.msra.mxu2 %v1314_v35  ;;  %939 = vmatpush.msra.mxu3 %v1330_v36  ;;  %v1395_v35 = vld [vmem:[%s3263_s0 + $0xb58] sm:$0xff] }
  0x96   :  { %899 = vmatpush.msra.mxu1 %v1298_v37  ;;  %v1363_v37 = vld [vmem:[%s3263_s0 + $0xa58] sm:$0xff] }
  0x97   :  { %920 = vmatpush.msra.mxu2 %v1313_v38  ;;  %940 = vmatpush.msra.mxu3 %v1329_v39  ;;  %v1377_v38 = vld [vmem:[%s3263_s0 + $0xac8] sm:$0xff]  ;;  %v1394_v39 = vld [vmem:[%s3263_s0 + $0xb50] sm:$0xff] }
  0x98   :  { %900 = vmatpush.msra.mxu1 %v1297_v40 }
  0x99   :  { %921 = vmatpush.msra.mxu2 %v1312_v41  ;;  %941 = vmatpush.msra.mxu3 %v1328_v42  ;;  %v1362_v41 = vld [vmem:[%s3263_s0 + $0xa50] sm:$0xff]  ;;  %v1376_v42 = vld [vmem:[%s3263_s0 + $0xac0] sm:$0xff] }
  0x9a   :  { %901 = vmatpush.msra.mxu1 %v1296_v43  ;;  %v1393_v43 = vld [vmem:[%s3263_s0 + $0xb48] sm:$0xff] }
  0x9b   :  { %922 = vmatpush.msra.mxu2 %v1311_v44  ;;  %942 = vmatpush.msra.mxu3 %v1327_v45 }
  0x9c   :  { %902 = vmatpush.msra.mxu1 %v1295_v46  ;;  %v1361_v46 = vld [vmem:[%s3263_s0 + $0xa48] sm:$0xff] }
  0x9d   :  { %923 = vmatpush.msra.mxu2 %v1310_v48  ;;  %943 = vmatpush.msra.mxu3 %v1326_v49  ;;  %v1392_v48 = vld [vmem:[%s3263_s0 + $0xb40] sm:$0xff] }
  0x9e   :  { %903 = vmatpush.msra.mxu1 %v1294_v56  ;;  %v1390_v56 = vld [vmem:[%s3263_s0 + $0xb30] sm:$0xff] }
  0x9f   :  { %924 = vmatpush.msra.mxu2 %v1309_v51  ;;  %944 = vmatpush.msra.mxu3 %v1325_v58  ;;  %v1374_v51 = vld [vmem:[%s3263_s0 + $0xab0] sm:$0xff] }
  0xa0   :  { %904 = vmatpush.msra.mxu1 %v1293_v59  ;;  %v1358_v58 = vld [vmem:[%s3263_s0 + $0xa30] sm:$0xff]  ;;  %v1372_v59 = vld [vmem:[%s3263_s0 + $0xaa0] sm:$0xff] }
  0xa1   :  { %925 = vmatpush.msra.mxu2 %v1308_v57  ;;  %945 = vmatpush.msra.mxu3 %v1324_v61 }
  0xa2   :  { %905 = vmatpush.msra.mxu1 %v1292_v0  ;;  %v1357_v0 = vld [vmem:[%s3263_s0 + $0xa28] sm:$0xff] }
  0xa3   :  { %926 = vmatpush.msra.mxu2 %v1307_v60  ;;  %946 = vmatpush.msra.mxu3 %v1323_v2  ;;  %v1389_v60 = vld [vmem:[%s3263_s0 + $0xb28] sm:$0xff]  ;;  %v1388_v2 = vld [vmem:[%s3263_s0 + $0xb20] sm:$0xff] }
  0xa4   :  { %906 = vmatpush.msra.mxu1 %v1291_v4  ;;  %v1356_v4 = vld [vmem:[%s3263_s0 + $0xa20] sm:$0xff] }
  0xa5   :  { %927 = vmatpush.msra.mxu2 %v1306_v1  ;;  %947 = vmatpush.msra.mxu3 %v1322_v7  ;;  %v1371_v1 = vld [vmem:[%s3263_s0 + $0xa98] sm:$0xff] }
  0xa6   :  { %907 = vmatpush.msra.mxu1 %v1290_v10  ;;  %v1387_v7 = vld [vmem:[%s3263_s0 + $0xb18] sm:$0xff]  ;;  %v1369_v10 = vld [vmem:[%s3263_s0 + $0xa88] sm:$0xff] }
  0xa7   :  { %928 = vmatpush.msra.mxu2 %v1305_v6  ;;  %948 = vmatpush.msra.mxu3 %v1321_v12  ;;  %v1370_v6 = vld [vmem:[%s3263_s0 + $0xa90] sm:$0xff] }
  0xa8   :  { %908 = vmatpush.msra.mxu1 %v1289_v14  ;;  %v1354_v14 = vld [vmem:[%s3263_s0 + $0xa10] sm:$0xff] }
  0xa9   :  { %929 = vmatpush.msra.mxu2 %v1304_v11  ;;  %949 = vmatpush.msra.mxu3 %v1320_v15  ;;  %v1386_v11 = vld [vmem:[%s3263_s0 + $0xb10] sm:$0xff]  ;;  %v1368_v15 = vld [vmem:[%s3263_s0 + $0xa80] sm:$0xff] }
  0xaa   :  { %930 = vmatmul.f32.vlgmr.msra.gmra.mxu2 %v2018_v5  ;;  %909 = vmatpush.msra.mxu1 %v1288_v21  ;;  %v1398_v5 = vld [vmem:[%s3263_s0 + $0xb70] sm:$0xff]  ;;  %v1351_v21 = vld [vmem:[%s3263_s0 + $0x9f8] sm:$0xff] }
  0xab   :  { %994 = vmatpush.msrb.mxu2 %v1383_v13  ;;  %1014 = vmatpush.msrb.mxu3 %v1399_v19  ;;  %v1447_v19 = vld [vmem:[%s3263_s0 + $0xcf8] sm:$0xff] }
  0xac   :  { %974 = vmatpush.msrb.mxu1 %v1367_v22  ;;  %v1353_v22 = vld [vmem:[%s3263_s0 + $0xa08] sm:$0xff] }
  0xad   :  { %995 = vmatpush.msrb.mxu2 %v1382_v17  ;;  %1015 = vmatpush.msrb.mxu3 %v1398_v5  ;;  %v1552_v5 = vld [vmem:[%s3264_s1 + $0x10] sm:$0xff] }
  0xae   :  { %910 = vmatmul.f32.vlgmr.msra.gmra.mxu1 %v1997_v63  ;;  %950 = vmatmul.f32.vlgmr.msra.gmra.mxu3 %v1552_v5  ;;  %v1553_v5 = vld [vmem:[%s3264_s1 + $0x28] sm:$0xff] }
  0xaf   :  { %996 = vmatpush.msrb.mxu2 %v1381_v23  ;;  %975 = vmatpush.msrb.mxu1 %v1366_v25  ;;  %v1384_v23 = vld [vmem:[%s3263_s0 + $0xb00] sm:$0xff]  ;;  %v1463_v25 = vld [vmem:[%s3263_s0 + $0xd78] sm:$0xff] }
  0xb0   :  { %1016 = vmatpush.msrb.mxu3 %v1397_v27  ;;  %v1352_v27 = vld [vmem:[%s3263_s0 + $0xa00] sm:$0xff] }
  0xb1   :  { %997 = vmatpush.msrb.mxu2 %v1380_v26  ;;  %976 = vmatpush.msrb.mxu1 %v1365_v29  ;;  %v1350_v26 = vld [vmem:[%s3263_s0 + $0x9f0] sm:$0xff]  ;;  %v1445_v29 = vld [vmem:[%s3263_s0 + $0xce8] sm:$0xff] }
  0xb2   :  { %1017 = vmatpush.msrb.mxu3 %v1396_v31  ;;  %v1462_v31 = vld [vmem:[%s3263_s0 + $0xd70] sm:$0xff] }
  0xb3   :  { %998 = vmatpush.msrb.mxu2 %v1379_v30  ;;  %977 = vmatpush.msrb.mxu1 %v1364_v33  ;;  %v1349_v30 = vld [vmem:[%s3263_s0 + $0x9e8] sm:$0xff]  ;;  %v1348_v33 = vld [vmem:[%s3263_s0 + $0x9e0] sm:$0xff] }
  0xb4   :  { %1018 = vmatpush.msrb.mxu3 %v1395_v35  ;;  %v1461_v35 = vld [vmem:[%s3263_s0 + $0xd68] sm:$0xff] }
  0xb5   :  { %999 = vmatpush.msrb.mxu2 %v1378_v34  ;;  %978 = vmatpush.msrb.mxu1 %v1363_v37  ;;  %v1591_v34 = vmov 1.0   ;;  %v1443_v37 = vld [vmem:[%s3263_s0 + $0xcd8] sm:$0xff] }
  0xb6   :  { %1019 = vmatpush.msrb.mxu3 %v1394_v39  ;;  %v1460_v39 = vld [vmem:[%s3263_s0 + $0xd60] sm:$0xff] }
  0xb7   :  { %1000 = vmatpush.msrb.mxu2 %v1377_v38  ;;  %979 = vmatpush.msrb.mxu1 %v1362_v41  ;;  %v1347_v38 = vld [vmem:[%s3263_s0 + $0x9d8] sm:$0xff]  ;;  %v1442_v41 = vld [vmem:[%s3263_s0 + $0xcd0] sm:$0xff] }
  0xb8   :  { %1020 = vmatpush.msrb.mxu3 %v1393_v43  ;;  %v1459_v43 = vld [vmem:[%s3263_s0 + $0xd58] sm:$0xff] }
  0xb9   :  { %1001 = vmatpush.msrb.mxu2 %v1376_v42  ;;  %980 = vmatpush.msrb.mxu1 %v1361_v46  ;;  %v1346_v42 = vld [vmem:[%s3263_s0 + $0x9d0] sm:$0xff]  ;;  %v1345_v46 = vld [vmem:[%s3263_s0 + $0x9c8] sm:$0xff] }
  0xba   :  { %1021 = vmatpush.msrb.mxu3 %v1392_v48  ;;  %v1426_v48 = vld [vmem:[%s3263_s0 + $0xc50] sm:$0xff] }
  0xbf   :  { %v305_v50 = vpop.f32.mrf.mxu0 }
  0xc2   :  { %v325_v47 = vpop.f32.mrf.mxu1 }
  0xc3   :  { %v326_v52 = vadd.f32 %v325_v47, %v305_v50  ;;  %v345_v53 = vpop.f32.mrf.mxu2  ;;  %v1375_v47 = vld [vmem:[%s3263_s0 + $0xab8] sm:$0xff]  ;;  %v1360_v50 = vld [vmem:[%s3263_s0 + $0xa40] sm:$0xff] }
  0xc4   :  { %1002 = vmatpush.msrb.mxu2 %v1375_v47  ;;  %981 = vmatpush.msrb.mxu1 %v1360_v50  ;;  %v1458_v47 = vld [vmem:[%s3263_s0 + $0xd50] sm:$0xff]  ;;  %v1344_v50 = vld [vmem:[%s3263_s0 + $0x9c0] sm:$0xff] }
  0xc5   :  { %v346_v54 = vadd.f32 %v345_v53, %v326_v52  ;;  %v1391_v52 = vld [vmem:[%s3263_s0 + $0xb38] sm:$0xff] }
  0xc6   :  { %v365_v55 = vpop.f32.mrf.mxu3  ;;  %1003 = vmatpush.msrb.mxu2 %v1374_v51  ;;  %1022 = vmatpush.msrb.mxu3 %v1391_v52  ;;  %v1457_v51 = vld [vmem:[%s3263_s0 + $0xd48] sm:$0xff] }
  0xc7   :  { %v366_v62 = vadd.f32 %v365_v55, %v346_v54  ;;  %v1359_v54 = vld [vmem:[%s3263_s0 + $0xa38] sm:$0xff]  ;;  %v1373_v55 = vld [vmem:[%s3263_s0 + $0xaa8] sm:$0xff] }
  0xc8   :  { %982 = vmatpush.msrb.mxu1 %v1359_v54  ;;  %1004 = vmatpush.msrb.mxu2 %v1373_v55  ;;  %v1425_v52 = vld [vmem:[%s3263_s0 + $0xc48] sm:$0xff]  ;;  %v1343_v54 = vld [vmem:[%s3263_s0 + $0x9b8] sm:$0xff]  ;;  %v1456_v55 = vld [vmem:[%s3263_s0 + $0xd40] sm:$0xff] }
  0xc9   :  { %v385_v3 = vpop.f32.mrf.mxu0  ;;  %1023 = vmatpush.msrb.mxu3 %v1390_v56  ;;  %v1424_v56 = vld [vmem:[%s3263_s0 + $0xc40] sm:$0xff] }
  0xca   :  { %v386_v8 = vadd.f32 %v385_v3, %v366_v62  ;;  %983 = vmatpush.msrb.mxu1 %v1358_v58  ;;  %1005 = vmatpush.msrb.mxu2 %v1372_v59  ;;  %v1342_v58 = vld [vmem:[%s3263_s0 + $0x9b0] sm:$0xff]  ;;  %v1455_v59 = vld [vmem:[%s3263_s0 + $0xd38] sm:$0xff] }
  0xcb   :  { %1024 = vmatpush.msrb.mxu3 %v1389_v60  ;;  %v1423_v60 = vld [vmem:[%s3263_s0 + $0xc38] sm:$0xff] }
  0xcc   :  { %v405_v9 = vpop.f32.mrf.mxu1  ;;  %984 = vmatpush.msrb.mxu1 %v1357_v0  ;;  %1006 = vmatpush.msrb.mxu2 %v1371_v1  ;;  %v1454_v0 = vld [vmem:[%s3263_s0 + $0xd30] sm:$0xff] }
  0xcd   :  { %v406_v16 = vadd.f32 %v405_v9, %v386_v8  ;;  %v425_v20 = vpop.f32.mrf.mxu2  ;;  %1025 = vmatpush.msrb.mxu3 %v1388_v2  ;;  %v1355_v9 = vld [vmem:[%s3263_s0 + $0xa18] sm:$0xff]  ;;  %v1422_v1 = vld [vmem:[%s3263_s0 + $0xc30] sm:$0xff]  ;;  %v1436_v2 = vld [vmem:[%s3263_s0 + $0xca0] sm:$0xff] }
  0xce   :  { %985 = vmatpush.msrb.mxu1 %v1356_v4  ;;  %1007 = vmatpush.msrb.mxu2 %v1370_v6  ;;  %v1453_v4 = vld [vmem:[%s3263_s0 + $0xd28] sm:$0xff] }
  0xcf   :  { %v426_v24 = vadd.f32 %v425_v20, %v406_v16  ;;  %1026 = vmatpush.msrb.mxu3 %v1387_v7  ;;  %v1385_v16 = vld [vmem:[%s3263_s0 + $0xb08] sm:$0xff]  ;;  %v1435_v7 = vld [vmem:[%s3263_s0 + $0xc98] sm:$0xff] }
  0xd0   :  { %v445_v28 = vpop.f32.mrf.mxu3  ;;  %986 = vmatpush.msrb.mxu1 %v1355_v9  ;;  %1008 = vmatpush.msrb.mxu2 %v1369_v10  ;;  %v1421_v6 = vld [vmem:[%s3263_s0 + $0xc28] sm:$0xff]  ;;  %v1452_v9 = vld [vmem:[%s3263_s0 + $0xd20] sm:$0xff] }
  0xd1   :  { %v446_v63 = vadd.f32 %v445_v28, %v426_v24  ;;  %1027 = vmatpush.msrb.mxu3 %v1386_v11  ;;  %v1446_v24 = vld [vmem:[%s3263_s0 + $0xcf0] sm:$0xff]  ;;  %v1431_v28 = vld [vmem:[%s3263_s0 + $0xc78] sm:$0xff]  ;;  %v1420_v10 = vld [vmem:[%s3263_s0 + $0xc20] sm:$0xff] }
  0xd2   :  { %987 = vmatpush.msrb.mxu1 %v1354_v14  ;;  %1009 = vmatpush.msrb.mxu2 %v1368_v15  ;;  %v1434_v11 = vld [vmem:[%s3263_s0 + $0xc90] sm:$0xff]  ;;  %v1419_v14 = vld [vmem:[%s3263_s0 + $0xc18] sm:$0xff]  ;;  %v1433_v15 = vld [vmem:[%s3263_s0 + $0xc88] sm:$0xff] }
  0xd3   :  { %1028 = vmatpush.msrb.mxu3 %v1385_v16  ;;  %v1337_v16 = vld [vmem:[%s3263_s0 + $0x988] sm:$0xff]  ;;  %1010 = vmatmul.f32.vlgmr.msrb.gmra.mxu2 %v1553_v5  ;;  %v1484_v5 = vld [vmem:[%s3263_s0 + $0xe20] sm:$0xff] }
  0xd4   :  { %1074 = vmatpush.msra.mxu2 %v1447_v19  ;;  %988 = vmatpush.msrb.mxu1 %v1353_v22  ;;  %v1418_v19 = vld [vmem:[%s3263_s0 + $0xc10] sm:$0xff]  ;;  %v1415_v22 = vld [vmem:[%s3263_s0 + $0xbf8] sm:$0xff] }
  0xd5   :  { %1029 = vmatpush.msrb.mxu3 %v1384_v23  ;;  %v1449_v23 = vld [vmem:[%s3263_s0 + $0xd08] sm:$0xff] }
  0xd6   :  { %1075 = vmatpush.msra.mxu2 %v1446_v24  ;;  %989 = vmatpush.msrb.mxu1 %v1352_v27  ;;  %v1414_v24 = vld [vmem:[%s3263_s0 + $0xbf0] sm:$0xff]  ;;  %v1448_v27 = vld [vmem:[%s3263_s0 + $0xd00] sm:$0xff] }
  0xd7   :  { %1094 = vmatpush.msra.mxu3 %v1463_v25  ;;  %v1511_v25 = vld [vmem:[%s3263_s0 + $0xef8] sm:$0xff] }
  0xd8   :  { %1054 = vmatpush.msra.mxu1 %v1431_v28  ;;  %1076 = vmatpush.msra.mxu2 %v1445_v29  ;;  %v1413_v28 = vld [vmem:[%s3263_s0 + $0xbe8] sm:$0xff]  ;;  %v1554_v29 = vld [vmem:[%s3264_s1 + $0x18] sm:$0xff] }
  0xd9   :  { %1095 = vmatpush.msra.mxu3 %v1462_v31  ;;  %v1510_v31 = vld [vmem:[%s3263_s0 + $0xef0] sm:$0xff] }
  0xdb   :  { %1096 = vmatpush.msra.mxu3 %v1461_v35  ;;  %v1556_v35 = vld [vmem:[%s3264_s1 + $0x20] sm:$0xff] }
  0xdc   :  { %990 = vmatmul.f32.vlgmr.msrb.gmra.mxu1 %v1556_v35  ;;  %v1513_v35 = vld [vmem:[%s3263_s0 + $0xf08] sm:$0xff] }
  0xdd   :  { %1097 = vmatpush.msra.mxu3 %v1460_v39  ;;  %v1526_v39 = vld [vmem:[%s3263_s0 + $0xf70] sm:$0xff] }
  0xdf   :  { %1098 = vmatpush.msra.mxu3 %v1459_v43  ;;  %v1525_v43 = vld [vmem:[%s3263_s0 + $0xf68] sm:$0xff] }
  0xe1   :  { %1099 = vmatpush.msra.mxu3 %v1458_v47  ;;  %v1507_v47 = vld [vmem:[%s3263_s0 + $0xed8] sm:$0xff] }
  0xe3   :  { %v465_v32 = vpop.f32.mrf.mxu0  ;;  %1100 = vmatpush.msra.mxu3 %v1457_v51  ;;  %v1492_v51 = vld [vmem:[%s3263_s0 + $0xe60] sm:$0xff] }
  0xe4   :  { %v466_v36 = vadd.f32 %v465_v32, %v446_v63  ;;  %v1430_v32 = vld [vmem:[%s3263_s0 + $0xc70] sm:$0xff]  ;;  %v1444_v63 = vld [vmem:[%s3263_s0 + $0xce0] sm:$0xff] }
  0xe5   :  { %1055 = vmatpush.msra.mxu1 %v1430_v32  ;;  %1077 = vmatpush.msra.mxu2 %v1444_v63  ;;  %v1527_v32 = vld [vmem:[%s3263_s0 + $0xf78] sm:$0xff]  ;;  %v1412_v63 = vld [vmem:[%s3263_s0 + $0xbe0] sm:$0xff] }
  0xe6   :  { %v485_v40 = vpop.f32.mrf.mxu1  ;;  %1101 = vmatpush.msra.mxu3 %v1456_v55  ;;  %v1559_v55 = vld [vmem:[%s3264_s1 + $0x40] sm:$0xff] }
  0xe7   :  { %v486_v45 = vadd.f32 %v485_v40, %v466_v36  ;;  %v1429_v36 = vld [vmem:[%s3263_s0 + $0xc68] sm:$0xff]  ;;  %v1428_v40 = vld [vmem:[%s3263_s0 + $0xc60] sm:$0xff]  ;;  %1078 = vmatpush.msra.mxu2 %v1443_v37 }
  0xe8   :  { %1056 = vmatpush.msra.mxu1 %v1429_v36  ;;  %1102 = vmatpush.msra.mxu3 %v1455_v59  ;;  %v1495_v36 = vld [vmem:[%s3263_s0 + $0xe78] sm:$0xff]  ;;  %v1509_v37 = vld [vmem:[%s3263_s0 + $0xee8] sm:$0xff]  ;;  %v1522_v59 = vld [vmem:[%s3263_s0 + $0xf50] sm:$0xff] }
  0xe9   :  { %v505_v44 = vpop.f32.mrf.mxu2  ;;  %1079 = vmatpush.msra.mxu2 %v1442_v41  ;;  %v1410_v41 = vld [vmem:[%s3263_s0 + $0xbd0] sm:$0xff] }
  0xea   :  { %v506_v49 = vadd.f32 %v505_v44, %v486_v45  ;;  %v1427_v44 = vld [vmem:[%s3263_s0 + $0xc58] sm:$0xff]  ;;  %v1441_v45 = vld [vmem:[%s3263_s0 + $0xcc8] sm:$0xff]  ;;  %1057 = vmatpush.msra.mxu1 %v1428_v40  ;;  %1103 = vmatpush.msra.mxu3 %v1454_v0  ;;  %v1494_v40 = vld [vmem:[%s3263_s0 + $0xe70] sm:$0xff] }
  0xeb   :  { %1080 = vmatpush.msra.mxu2 %v1441_v45  ;;  %v1409_v45 = vld [vmem:[%s3263_s0 + $0xbc8] sm:$0xff] }
  0xec   :  { %v525_v53 = vpop.f32.mrf.mxu3  ;;  %1058 = vmatpush.msra.mxu1 %v1427_v44  ;;  %1104 = vmatpush.msra.mxu3 %v1453_v4  ;;  %v1493_v44 = vld [vmem:[%s3263_s0 + $0xe68] sm:$0xff]  ;;  %v1520_v4 = vld [vmem:[%s3263_s0 + $0xf40] sm:$0xff] }
  0xed   :  { %v526_v57 = vadd.f32 %v525_v53, %v506_v49  ;;  %v1440_v49 = vld [vmem:[%s3263_s0 + $0xcc0] sm:$0xff]  ;;  %v1439_v53 = vld [vmem:[%s3263_s0 + $0xcb8] sm:$0xff]  ;;  %v1521_v0 = vld [vmem:[%s3263_s0 + $0xf48] sm:$0xff] }
  0xee   :  { %1059 = vmatpush.msra.mxu1 %v1426_v48  ;;  %1081 = vmatpush.msra.mxu2 %v1440_v49  ;;  %v1524_v48 = vld [vmem:[%s3263_s0 + $0xf60] sm:$0xff] }
  0xef   :  { %1105 = vmatpush.msra.mxu3 %v1452_v9  ;;  %v1408_v49 = vld [vmem:[%s3263_s0 + $0xbc0] sm:$0xff]  ;;  %v1519_v9 = vld [vmem:[%s3263_s0 + $0xf38] sm:$0xff] }
  0xf0   :  { %1060 = vmatpush.msra.mxu1 %v1425_v52  ;;  %1082 = vmatpush.msra.mxu2 %v1439_v53  ;;  %v1506_v52 = vld [vmem:[%s3263_s0 + $0xed0] sm:$0xff]  ;;  %v1407_v53 = vld [vmem:[%s3263_s0 + $0xbb8] sm:$0xff] }
  0xf2   :  { %1061 = vmatpush.msra.mxu1 %v1424_v56  ;;  %v1491_v56 = vld [vmem:[%s3263_s0 + $0xe58] sm:$0xff] }
  0xf4   :  { %1062 = vmatpush.msra.mxu1 %v1423_v60  ;;  %v1490_v60 = vld [vmem:[%s3263_s0 + $0xe50] sm:$0xff] }
  0xf6   :  { %1063 = vmatpush.msra.mxu1 %v1422_v1  ;;  %v1489_v1 = vld [vmem:[%s3263_s0 + $0xe48] sm:$0xff] }
  0xf8   :  { %1064 = vmatpush.msra.mxu1 %v1421_v6  ;;  %v1488_v6 = vld [vmem:[%s3263_s0 + $0xe40] sm:$0xff] }
  0xfa   :  { %1065 = vmatpush.msra.mxu1 %v1420_v10  ;;  %v1487_v10 = vld [vmem:[%s3263_s0 + $0xe38] sm:$0xff] }
  0xfc   :  { %1066 = vmatpush.msra.mxu1 %v1419_v14  ;;  %v1486_v14 = vld [vmem:[%s3263_s0 + $0xe30] sm:$0xff] }
  0xfe   :  { %1067 = vmatpush.msra.mxu1 %v1418_v19  ;;  %v1485_v19 = vld [vmem:[%s3263_s0 + $0xe28] sm:$0xff] }
 0x105   :  { %v545_v61 = vpop.f32.mrf.mxu0 }
 0x106   :  { %v546_v62 = vadd.f32 %v545_v61, %v526_v57  ;;  %v1438_v57 = vld [vmem:[%s3263_s0 + $0xcb0] sm:$0xff]  ;;  %v1437_v61 = vld [vmem:[%s3263_s0 + $0xca8] sm:$0xff] }
 0x107   :  { %v565_v3 = vpop.f32.mrf.mxu1  ;;  %1083 = vmatpush.msra.mxu2 %v1438_v57  ;;  %v1505_v57 = vld [vmem:[%s3263_s0 + $0xec8] sm:$0xff] }
 0x108   :  { %v566_v8 = vadd.f32 %v565_v3, %v546_v62  ;;  %v1341_v62 = vld [vmem:[%s3263_s0 + $0x9a8] sm:$0xff]  ;;  %v1340_v3 = vld [vmem:[%s3263_s0 + $0x9a0] sm:$0xff] }
 0x109   :  { %1084 = vmatpush.msra.mxu2 %v1437_v61  ;;  %v1504_v61 = vld [vmem:[%s3263_s0 + $0xec0] sm:$0xff] }
 0x10b   :  { %v585_v12 = vpop.f32.mrf.mxu2  ;;  %1085 = vmatpush.msra.mxu2 %v1436_v2  ;;  %v1503_v2 = vld [vmem:[%s3263_s0 + $0xeb8] sm:$0xff] }
 0x10c   :  { %v586_v13 = vadd.f32 %v585_v12, %v566_v8  ;;  %v1339_v8 = vld [vmem:[%s3263_s0 + $0x998] sm:$0xff]  ;;  %v1338_v12 = vld [vmem:[%s3263_s0 + $0x990] sm:$0xff] }
 0x10d   :  { %v605_v17 = vpop.f32.mrf.mxu3  ;;  %1086 = vmatpush.msra.mxu2 %v1435_v7  ;;  %v1502_v7 = vld [vmem:[%s3263_s0 + $0xeb0] sm:$0xff] }
 0x10e   :  { %v606_v20 = vadd.f32 %v605_v17, %v586_v13  ;;  %v1451_v13 = vld [vmem:[%s3263_s0 + $0xd18] sm:$0xff]  ;;  %v1450_v17 = vld [vmem:[%s3263_s0 + $0xd10] sm:$0xff] }
 0x10f   :  { %1087 = vmatpush.msra.mxu2 %v1434_v11  ;;  %1106 = vmatpush.msra.mxu3 %v1451_v13  ;;  %v1501_v11 = vld [vmem:[%s3263_s0 + $0xea8] sm:$0xff]  ;;  %v1518_v13 = vld [vmem:[%s3263_s0 + $0xf30] sm:$0xff] }
 0x110   :  { %1286 = vmatpush.xpose.msk.msra.mxu0 %vm608_vm0, %v606_v20  ;;  %v1336_v20 = vld [vmem:[%s3263_s0 + $0x980] sm:$0xff] }
 0x111   :  { %1088 = vmatpush.msra.mxu2 %v1433_v15  ;;  %1107 = vmatpush.msra.mxu3 %v1450_v17  ;;  %v1500_v15 = vld [vmem:[%s3263_s0 + $0xea0] sm:$0xff]  ;;  %v1517_v17 = vld [vmem:[%s3263_s0 + $0xf28] sm:$0xff] }
 0x113   :  { %1287 = vmatmul.msk.f32.vlgmr.msra.gmra.mxu0 %vm608_vm0, %v1591_v34  ;;  %1108 = vmatpush.msra.mxu3 %v1449_v23  ;;  %v1479_v23 = vld [vmem:[%s3263_s0 + $0xdf8] sm:$0xff] }
 0x114   :  { %954 = vmatpush.msrb.mxu0 %v1351_v21  ;;  %v1432_v21 = vld [vmem:[%s3263_s0 + $0xc80] sm:$0xff] }
 0x115   :  { %1089 = vmatpush.msra.mxu2 %v1432_v21  ;;  %1109 = vmatpush.msra.mxu3 %v1448_v27  ;;  %v1400_v21 = vld [vmem:[%s3263_s0 + $0xb80] sm:$0xff]  ;;  %v1483_v27 = vld [vmem:[%s3263_s0 + $0xe18] sm:$0xff] }
 0x116   :  { %955 = vmatpush.msrb.mxu0 %v1350_v26  ;;  %v1417_v26 = vld [vmem:[%s3263_s0 + $0xc08] sm:$0xff] }
 0x117   :  { %1154 = vmatpush.msrb.mxu2 %v1511_v25  ;;  %1068 = vmatpush.msra.mxu1 %v1417_v26  ;;  %v1478_v25 = vld [vmem:[%s3263_s0 + $0xdf0] sm:$0xff]  ;;  %v1515_v26 = vld [vmem:[%s3263_s0 + $0xf18] sm:$0xff] }
 0x118   :  { %956 = vmatpush.msrb.mxu0 %v1349_v30  ;;  %v1555_v30 = vld [vmem:[%s3264_s1 + $0x30] sm:$0xff] }
 0x119   :  { %1030 = vmatmul.f32.vlgmr.msrb.gmra.mxu3 %v1555_v30  ;;  %1155 = vmatpush.msrb.mxu2 %v1510_v31  ;;  %v1560_v30 = vld [vmem:[%s3264_s1 + $0x38] sm:$0xff]  ;;  %v1514_v31 = vld [vmem:[%s3263_s0 + $0xf10] sm:$0xff] }
 0x11a   :  { %957 = vmatpush.msrb.mxu0 %v1348_v33  ;;  %v1416_v33 = vld [vmem:[%s3263_s0 + $0xc00] sm:$0xff]  ;;  %1174 = vmatpush.msrb.mxu3 %v1527_v32  ;;  %v1482_v32 = vld [vmem:[%s3263_s0 + $0xe10] sm:$0xff] }
 0x11b   :  { %1069 = vmatpush.msra.mxu1 %v1416_v33  ;;  %1156 = vmatpush.msrb.mxu2 %v1509_v37  ;;  %v1476_v33 = vld [vmem:[%s3263_s0 + $0xde0] sm:$0xff]  ;;  %v1475_v37 = vld [vmem:[%s3263_s0 + $0xdd8] sm:$0xff] }
 0x11c   :  { %958 = vmatpush.msrb.mxu0 %v1347_v38  ;;  %v1411_v38 = vld [vmem:[%s3263_s0 + $0xbd8] sm:$0xff]  ;;  %1175 = vmatpush.msrb.mxu3 %v1526_v39  ;;  %v1480_v39 = vld [vmem:[%s3263_s0 + $0xe00] sm:$0xff] }
 0x11d   :  { %1134 = vmatpush.msrb.mxu1 %v1495_v36  ;;  %v1481_v36 = vld [vmem:[%s3263_s0 + $0xe08] sm:$0xff] }
 0x11e   :  { %959 = vmatpush.msrb.mxu0 %v1346_v42  ;;  %v1508_v42 = vld [vmem:[%s3263_s0 + $0xee0] sm:$0xff]  ;;  %1176 = vmatpush.msrb.mxu3 %v1525_v43 }
 0x11f   :  { %1135 = vmatpush.msrb.mxu1 %v1494_v40  ;;  %1157 = vmatpush.msrb.mxu2 %v1508_v42  ;;  %v1474_v40 = vld [vmem:[%s3263_s0 + $0xdd0] sm:$0xff]  ;;  %v1562_v43 = vld [vmem:[%s3264_s1 + $0x60] sm:$0xff] }
 0x120   :  { %960 = vmatpush.msrb.mxu0 %v1345_v46  ;;  %v1557_v46 = vld [vmem:[%s3264_s1 + $0x48] sm:$0xff]  ;;  %1177 = vmatpush.msrb.mxu3 %v1524_v48  ;;  %v1561_v42 = vld [vmem:[%s3264_s1 + $0x70] sm:$0xff]  ;;  %v1467_v48 = vld [vmem:[%s3263_s0 + $0xd98] sm:$0xff] }
 0x121   :  { %1090 = vmatmul.f32.vlgmr.msra.gmra.mxu2 %v1557_v46  ;;  %1136 = vmatpush.msrb.mxu1 %v1493_v44  ;;  %v1471_v44 = vld [vmem:[%s3263_s0 + $0xdb8] sm:$0xff]  ;;  %v1469_v46 = vld [vmem:[%s3263_s0 + $0xda8] sm:$0xff] }
 0x122   :  { %961 = vmatpush.msrb.mxu0 %v1344_v50  ;;  %v1558_v50 = vld [vmem:[%s3264_s1 + $0x50] sm:$0xff]  ;;  %1158 = vmatpush.msrb.mxu2 %v1507_v47  ;;  %v1468_v47 = vld [vmem:[%s3263_s0 + $0xda0] sm:$0xff] }
 0x123   :  { %1110 = vmatmul.f32.vlgmr.msra.gmra.mxu3 %v1558_v50  ;;  %1070 = vmatmul.f32.vlgmr.msra.gmra.mxu1 %v1559_v55  ;;  %v1465_v50 = vld [vmem:[%s3263_s0 + $0xd88] sm:$0xff] }
 0x124   :  { %962 = vmatpush.msrb.mxu0 %v1343_v54  ;;  %v1523_v54 = vld [vmem:[%s3263_s0 + $0xf58] sm:$0xff]  ;;  %1137 = vmatpush.msrb.mxu1 %v1492_v51  ;;  %v1464_v51 = vld [vmem:[%s3263_s0 + $0xd80] sm:$0xff]  ;;  %v1541_v55 = vld [vmem:[%s3263_s0 + $0xfe8] sm:$0xff] }
 0x125   :  { %1159 = vmatpush.msrb.mxu2 %v1506_v52  ;;  %1178 = vmatpush.msrb.mxu3 %v1523_v54  ;;  %v1543_v52 = vld [vmem:[%s3263_s0 + $0xff8] sm:$0xff]  ;;  %v1542_v54 = vld [vmem:[%s3263_s0 + $0xff0] sm:$0xff] }
 0x126   :  { %963 = vmatpush.msrb.mxu0 %v1342_v58  ;;  %v1406_v58 = vld [vmem:[%s3263_s0 + $0xbb0] sm:$0xff]  ;;  %1138 = vmatpush.msrb.mxu1 %v1491_v56  ;;  %v1540_v56 = vld [vmem:[%s3263_s0 + $0xfe0] sm:$0xff] }
 0x127   :  { %1160 = vmatpush.msrb.mxu2 %v1505_v57  ;;  %1179 = vmatpush.msrb.mxu3 %v1522_v59  ;;  %v1539_v57 = vld [vmem:[%s3263_s0 + $0xfd8] sm:$0xff]  ;;  %v1537_v59 = vld [vmem:[%s3263_s0 + $0xfc8] sm:$0xff] }
 0x128   :  { %964 = vmatpush.msrb.mxu0 %v1341_v62  ;;  %v1405_v62 = vld [vmem:[%s3263_s0 + $0xba8] sm:$0xff]  ;;  %1139 = vmatpush.msrb.mxu1 %v1490_v60  ;;  %v1536_v60 = vld [vmem:[%s3263_s0 + $0xfc0] sm:$0xff] }
 0x129   :  { %1161 = vmatpush.msrb.mxu2 %v1504_v61  ;;  %1180 = vmatpush.msrb.mxu3 %v1521_v0  ;;  %v1535_v61 = vld [vmem:[%s3263_s0 + $0xfb8] sm:$0xff]  ;;  %v1533_v0 = vld [vmem:[%s3263_s0 + $0xfa8] sm:$0xff] }
 0x12a   :  { %965 = vmatpush.msrb.mxu0 %v1340_v3  ;;  %v1404_v3 = vld [vmem:[%s3263_s0 + $0xba0] sm:$0xff]  ;;  %1140 = vmatpush.msrb.mxu1 %v1489_v1 }
 0x12b   :  { %1162 = vmatpush.msrb.mxu2 %v1503_v2  ;;  %1181 = vmatpush.msrb.mxu3 %v1520_v4  ;;  %v1532_v1 = vld [vmem:[%s3263_s0 + $0xfa0] sm:$0xff]  ;;  %v1531_v2 = vld [vmem:[%s3263_s0 + $0xf98] sm:$0xff]  ;;  %v1529_v4 = vld [vmem:[%s3263_s0 + $0xf88] sm:$0xff] }
 0x12c   :  { %966 = vmatpush.msrb.mxu0 %v1339_v8  ;;  %v1403_v8 = vld [vmem:[%s3263_s0 + $0xb98] sm:$0xff]  ;;  %1141 = vmatpush.msrb.mxu1 %v1488_v6  ;;  %v1528_v6 = vld [vmem:[%s3263_s0 + $0xf80] sm:$0xff] }
 0x12d   :  { %1163 = vmatpush.msrb.mxu2 %v1502_v7  ;;  %1182 = vmatpush.msrb.mxu3 %v1519_v9  ;;  %v1564_v7 = vld [vmem:[%s3264_s1 + $0x78] sm:$0xff]  ;;  %v931_v9 = vpop.f32.mrf.mxu2 }
 0x12e   :  { %967 = vmatpush.msrb.mxu0 %v1338_v12  ;;  %v1402_v12 = vld [vmem:[%s3263_s0 + $0xb90] sm:$0xff]  ;;  %1142 = vmatpush.msrb.mxu1 %v1487_v10  ;;  %v911_v10 = vpop.f32.mrf.mxu1 }
 0x12f   :  { %1164 = vmatpush.msrb.mxu2 %v1501_v11  ;;  %1183 = vmatpush.msrb.mxu3 %v1518_v13  ;;  %v932_v11 = vadd.f32 %v931_v9, %v911_v10 }
 0x130   :  { %968 = vmatpush.msrb.mxu0 %v1337_v16  ;;  %v1401_v16 = vld [vmem:[%s3263_s0 + $0xb88] sm:$0xff]  ;;  %1143 = vmatpush.msrb.mxu1 %v1486_v14 }
 0x131   :  { %1165 = vmatpush.msrb.mxu2 %v1500_v15  ;;  %1184 = vmatpush.msrb.mxu3 %v1517_v17 }
 0x132   :  { %969 = vmatpush.msrb.mxu0 %v1336_v20  ;;  %v1499_v20 = vld [vmem:[%s3263_s0 + $0xe98] sm:$0xff]  ;;  %1144 = vmatpush.msrb.mxu1 %v1485_v19 }
 0x133   :  { %970 = vmatmul.f32.vlgmr.msrb.gmra.mxu0 %v1554_v29  ;;  %1166 = vmatpush.msrb.mxu2 %v1499_v20  ;;  %v1477_v29 = vld [vmem:[%s3263_s0 + $0xde8] sm:$0xff] }
 0x134   :  { %1034 = vmatpush.msra.mxu0 %v1415_v22  ;;  %v1516_v22 = vld [vmem:[%s3263_s0 + $0xf20] sm:$0xff]  ;;  %1145 = vmatpush.msrb.mxu1 %v1484_v5 }
 0x135   :  { %1185 = vmatpush.msrb.mxu3 %v1516_v22 }
 0x136   :  { %1035 = vmatpush.msra.mxu0 %v1414_v24  ;;  %v1498_v24 = vld [vmem:[%s3263_s0 + $0xe90] sm:$0xff]  ;;  %1146 = vmatpush.msrb.mxu1 %v1483_v27 }
 0x137   :  { %1167 = vmatpush.msrb.mxu2 %v1498_v24  ;;  %1186 = vmatpush.msrb.mxu3 %v1515_v26 }
 0x138   :  { %1036 = vmatpush.msra.mxu0 %v1413_v28  ;;  %v1497_v28 = vld [vmem:[%s3263_s0 + $0xe88] sm:$0xff]  ;;  %1147 = vmatpush.msrb.mxu1 %v1482_v32 }
 0x139   :  { %1168 = vmatpush.msrb.mxu2 %v1497_v28  ;;  %1187 = vmatpush.msrb.mxu3 %v1514_v31 }
 0x13a   :  { %1037 = vmatpush.msra.mxu0 %v1412_v63  ;;  %v1496_v63 = vld [vmem:[%s3263_s0 + $0xe80] sm:$0xff]  ;;  %1148 = vmatpush.msrb.mxu1 %v1481_v36 }
 0x13b   :  { %1169 = vmatpush.msrb.mxu2 %v1496_v63  ;;  %1188 = vmatpush.msrb.mxu3 %v1513_v35 }
 0x13c   :  { %1038 = vmatpush.msra.mxu0 %v1411_v38  ;;  %v1512_v38 = vld [vmem:[%s3263_s0 + $0xf00] sm:$0xff]  ;;  %1170 = vmatmul.f32.vlgmr.msrb.gmra.mxu2 %v2432_v18 }
 0x13d   :  { %1189 = vmatpush.msrb.mxu3 %v1512_v38  ;;  %1149 = vmatpush.msrb.mxu1 %v1480_v39  ;;  %v1472_v18 = vld [vmem:[%s3263_s0 + $0xdc0] sm:$0xff] }
 0x13e   :  { %1039 = vmatpush.msra.mxu0 %v1410_v41  ;;  %v1473_v41 = vld [vmem:[%s3263_s0 + $0xdc8] sm:$0xff]  ;;  %1190 = vmatmul.f32.vlgmr.msrb.gmra.mxu3 %v1561_v42 }
 0x13f   :  { %1150 = vmatmul.f32.vlgmr.msrb.gmra.mxu1 %v1562_v43  ;;  %v31_v43 = vld [vmem:[%s3265_s2] sm:$0x1]  ;;  %s1592_s2 = smov [#allocation2]  }
 0x140   :  { %1040 = vmatpush.msra.mxu0 %v1409_v45  ;;  %v1470_v45 = vld [vmem:[%s3263_s0 + $0xdb0] sm:$0xff]  ;;  %s1275_s14 = sshll.u32 %s1592_s2, 4  ;;  %s1276_s14 = int_to_ptr.vmem [resolvable:$true] %s1275_s14 }
 0x142   :  { %1041 = vmatpush.msra.mxu0 %v1408_v49  ;;  %v1466_v49 = vld [vmem:[%s3263_s0 + $0xd90] sm:$0xff] }
 0x144   :  { %1042 = vmatpush.msra.mxu0 %v1407_v53  ;;  %v1563_v53 = vld [vmem:[%s3264_s1 + $0x58] sm:$0xff] }
 0x146   :  { %1043 = vmatpush.msra.mxu0 %v1406_v58  ;;  %v1538_v58 = vld [vmem:[%s3263_s0 + $0xfd0] sm:$0xff] }
 0x148   :  { %1044 = vmatpush.msra.mxu0 %v1405_v62  ;;  %v1534_v62 = vld [vmem:[%s3263_s0 + $0xfb0] sm:$0xff] }
 0x14a   :  { %1045 = vmatpush.msra.mxu0 %v1404_v3  ;;  %v1530_v3 = vld [vmem:[%s3263_s0 + $0xf90] sm:$0xff] }
 0x14c   :  { %1046 = vmatpush.msra.mxu0 %v1403_v8 }
 0x14e   :  { %1047 = vmatpush.msra.mxu0 %v1402_v12  ;;  %v951_v12 = vpop.f32.mrf.mxu3 }
 0x14f   :  { %v952_v13 = vadd.f32 %v951_v12, %v932_v11 }
 0x150   :  { %1048 = vmatpush.msra.mxu0 %v1401_v16 }
 0x152   :  { %1049 = vmatpush.msra.mxu0 %v1400_v21 }
 0x153   :  { %1050 = vmatmul.f32.vlgmr.msra.gmra.mxu0 %v1560_v30 }
 0x154   :  { %1114 = vmatpush.msrb.mxu0 %v1479_v23 }
 0x156   :  { %1115 = vmatpush.msrb.mxu0 %v1478_v25  ;;  %v1011_v19 = vpop.f32.mrf.mxu2 }
 0x158   :  { %1116 = vmatpush.msrb.mxu0 %v1477_v29 }
 0x159   :  { %v991_v16 = vpop.f32.mrf.mxu1 }
 0x15a   :  { %1117 = vmatpush.msrb.mxu0 %v1476_v33 }
 0x15c   :  { %1118 = vmatpush.msrb.mxu0 %v1475_v37 }
 0x15e   :  { %1119 = vmatpush.msrb.mxu0 %v1474_v40 }
 0x160   :  { %1120 = vmatpush.msrb.mxu0 %v1473_v41 }
 0x162   :  { %1121 = vmatpush.msrb.mxu0 %v1472_v18 }
 0x164   :  { %1122 = vmatpush.msrb.mxu0 %v1471_v44 }
 0x166   :  { %1123 = vmatpush.msrb.mxu0 %v1470_v45 }
 0x168   :  { %1124 = vmatpush.msrb.mxu0 %v1469_v46 }
 0x16a   :  { %1125 = vmatpush.msrb.mxu0 %v1468_v47 }
 0x16c   :  { %1126 = vmatpush.msrb.mxu0 %v1467_v48 }
 0x16e   :  { %1127 = vmatpush.msrb.mxu0 %v1466_v49 }
 0x170   :  { %1128 = vmatpush.msrb.mxu0 %v1465_v50 }
 0x172   :  { %1129 = vmatpush.msrb.mxu0 %v1464_v51 }
 0x173   :  { %1130 = vmatmul.f32.vlgmr.msrb.gmra.mxu0 %v1563_v53 }
 0x174   :  { %1194 = vmatpush.msra.mxu0 %v1543_v52 }
 0x176   :  { %1195 = vmatpush.msra.mxu0 %v1542_v54 }
 0x178   :  { %1196 = vmatpush.msra.mxu0 %v1541_v55 }
 0x17a   :  { %1197 = vmatpush.msra.mxu0 %v1540_v56 }
 0x17c   :  { %1198 = vmatpush.msra.mxu0 %v1539_v57 }
 0x17e   :  { %1199 = vmatpush.msra.mxu0 %v1538_v58 }
 0x180   :  { %1200 = vmatpush.msra.mxu0 %v1537_v59 }
 0x182   :  { %1201 = vmatpush.msra.mxu0 %v1536_v60 }
 0x184   :  { %1202 = vmatpush.msra.mxu0 %v1535_v61 }
 0x186   :  { %1203 = vmatpush.msra.mxu0 %v1534_v62 }
 0x188   :  { %1204 = vmatpush.msra.mxu0 %v1533_v0 }
 0x18a   :  { %1205 = vmatpush.msra.mxu0 %v1532_v1 }
 0x18c   :  { %1206 = vmatpush.msra.mxu0 %v1531_v2 }
 0x18e   :  { %1207 = vmatpush.msra.mxu0 %v1530_v3 }
 0x190   :  { %1208 = vmatpush.msra.mxu0 %v1529_v4  ;;  %v632_v8 = vpop.f32.mrf.mxu0 }
 0x191   :  { %v635_v41 = vmul.f32 0.020408163, %v632_v8 }
 0x192   :  { %1209 = vmatpush.msra.mxu0 %v1528_v6 }
 0x193   :  { %1210 = vmatmul.f32.vlgmr.msra.gmra.mxu0 %v1564_v7  ;;  %v636_v44 = vadd.f32 %v635_v41, %v31_v43 }
 0x19c   :  { %v1031_v21 = vpop.f32.mrf.mxu3 }
 0x1a0   :  { %v1071_v24 = vpop.f32.mrf.mxu1 }
 0x1a4   :  { %v1091_v26 = vpop.f32.mrf.mxu2 }
 0x1a6   :  { %v1111_v28 = vpop.f32.mrf.mxu3 }
 0x1b0   :  { %v971_v14 = vpop.f32.mrf.mxu0 }
 0x1b1   :  { %v972_v15 = vadd.f32 %v971_v14, %v952_v13 }
 0x1b3   :  { %v992_v17 = vadd.f32 %v991_v16, %v972_v15 }
 0x1b5   :  { %v1012_v20 = vadd.f32 %v1011_v19, %v992_v17 }
 0x1b7   :  { %v1032_v22 = vadd.f32 %v1031_v21, %v1012_v20 }
 0x1bc   :  { %v1151_v32 = vpop.f32.mrf.mxu1 }
 0x1bf   :  { %v1171_v33 = vpop.f32.mrf.mxu2 }
 0x1c1   :  { %v1191_v36 = vpop.f32.mrf.mxu3 }
 0x1d0   :  { %v1051_v23 = vpop.f32.mrf.mxu0 }
 0x1d1   :  { %v1052_v5 = vadd.f32 %v1051_v23, %v1032_v22 }
 0x1d3   :  { %v1072_v25 = vadd.f32 %v1071_v24, %v1052_v5 }
 0x1d5   :  { %v1092_v27 = vadd.f32 %v1091_v26, %v1072_v25 }
 0x1d7   :  { %v1112_v30 = vadd.f32 %v1111_v28, %v1092_v27 }
 0x1f0   :  { %v1131_v29 = vpop.f32.mrf.mxu0 }
 0x1f1   :  { %v1132_v31 = vadd.f32 %v1131_v29, %v1112_v30 }
 0x1f3   :  { %v1152_v63 = vadd.f32 %v1151_v32, %v1132_v31 }
 0x1f5   :  { %v1172_v35 = vadd.f32 %v1171_v33, %v1152_v63 }
 0x1f7   :  { %v1192_v37 = vadd.f32 %v1191_v36, %v1172_v35 }
 0x210   :  { %v1211_v38 = vpop.f32.mrf.mxu0 }
 0x211   :  { %v1212_v39 = vadd.f32 %v1211_v38, %v1192_v37 }
 0x213   :  { %1544 = vmatpush.xpose.msk.msra.mxu1 %vm608_vm0, %v1212_v39 }
 0x216   :  { %1545 = vmatmul.msk.f32.vlgmr.msra.gmra.mxu1 %vm608_vm0, %v1591_v34 }
 0x293   :  { %v1234_v40 = vpop.f32.mrf.mxu1 }
 0x294   :  { %v1237_v42 = vmul.f32 0.020408163, %v1234_v40 }
 0x296   :  { %v1238_v18 = vadd.f32 %v1237_v42, %v31_v43 }
 0x298   :  { %v1240_v45 = vrot.slane %v1238_v18, 7 }
 0x29a   :  { %v1243_v46 = vsel %vm1242_vm1, %v636_v44, %v1240_v45 }
 0x29b   :  { %v1245_v47 = vsel %vm1244_vm2, %v1243_v46, -inf }
 0x29c   :  { %1246 = vmax.xlane.f32.xlu0 %v1245_v47 }
 0x30f   :  { %v1247_v48 = vpop.xlane.xlu0 %1246 }
 0x310   :  { %v1248_v49 = vsub.f32 %v1243_v46, %v1247_v48 }
 0x312   :  { %v1249_v50 = vmul.f32 1.442695, %v1248_v49 }
 0x314   :  { %1548 = vpow2.f32 %v1249_v50 }
 0x31a   :  { %v1549_v34 = vpop.eup %1548 }
 0x31b   :  { %v1251_v51 = vsel %vm1244_vm2, %v1549_v34, 0.0 }
 0x31c   :  { %1252 = vadd.xlane.f32.xlu0 %v1251_v51 }
 0x38f   :  { %v1253_v52 = vpop.xlane.xlu0 %1252 }
 0x390   :  { %1550 = vrcp.f32 %v1253_v52  ;;  %v1265_v56 = vand.u32 2147483648, %v1253_v52  ;;  %v1263_v58 = vand.u32 2147483647, %v1253_v52  ;;  %vm1259_vm4 = vweird.f32 %v1253_v52 }
 0x392   :  { %v1266_v60 = vor.u32 1.1754944e-38, %v1265_v56  ;;  %vm1264_vm6 = vcmp.eq.f32.partialorder %v1263_v58, 8.507059e+37 }
 0x396   :  { %v1551_v53 = vpop.eup %1550 }
 0x397   :  { %v1255_v54 = vmul.f32 %v1551_v53, %v1253_v52  ;;  %vm1260_vm3 = vweird.f32 %v1551_v53 }
 0x398   :  { %vm1261_vm5 = vmor %vm1259_vm4, %vm1260_vm3 }
 0x399   :  { %v1256_v55 = vsub.f32 1.0, %v1255_v54 }
 0x39b   :  { %v1257_v57 = vmul.f32 %v1551_v53, %v1256_v55 }
 0x39d   :  { %v1258_v59 = vadd.f32 %v1551_v53, %v1257_v57 }
 0x39f   :  { %v1262_v61 = vsel %vm1261_vm5, %v1551_v53, %v1258_v59 }
 0x3a0   :  { %v1267_v62 = vsel %vm1264_vm6, %v1266_v60, %v1262_v61 }
 0x3a1   :  { %v1268_v0 = vmul.f32 %v1549_v34, %v1267_v62 }
 0x3a3   :  { %1269 = vst.msk [vmem:[#allocation2] sm:$0x3] %vm1244_vm2, %v1268_v0 }
 0x3a4   :  { %1280 = dma.vmem_to_hbm [thread:$0]  %s1276_s14, 32, %s1278_s17, [#allocation3]  }
 0x3a5   :  { %1589 = dma.done.wait [#allocation3], 32  }
 0x3a6   :  { %1590 = vsyncadd [#allocation3], 4294967264 }
 0x3a7   :  { %1285 = vsyncpa [#allocation3], 1 }

</bundles_post_ra>
